<compile_context>
chip_gen: v7x
topology: tpu7x:2x2x1
jax: 0.10.0
libtpu: 0.0.40
codegen_flags: <defaults>
</compile_context>

<pallas_src>
import functools

import jax
import jax.numpy as jnp
from jax import lax
from jax.experimental import pallas as pl
from jax.experimental.pallas import tpu as pltpu

NUM_CLASSES = 20              # LIP parsing has 20 classes

_MIN_MXU_CHANNELS = 32        # switch to the MXU kernel at/above this width
_MXU_CHUNK_ROWS = 256         # pixel rows per MXU matmul chunk
_TARGET_BLOCK_BYTES = 8 * 1024 * 1024    # ~8 MiB input block per grid step
_VMEM_LIMIT_BYTES = 32 * 1024 * 1024     # explicit; safe on v5e/v6e/v7x


def _round_up(x, m):
    return ((x + m - 1) // m) * m


def _largest_mult8_divisor(r, cap):
    """Largest multiple-of-8 divisor of `r` (itself a multiple of 8) <= cap."""
    t = min(cap, r)
    t -= t % 8
    while t > 8 and r % t != 0:
        t -= 8
    return max(t, 8)


def _pick_block_rows(r, c, batch, elt_bytes):
    """Rows (of 128 pixels) per grid step for the VPU kernel.

    VMEM-aware: caps the (C, TR, 128) input block at ~_TARGET_BLOCK_BYTES so
    double-buffered input + the index output stay well inside the 32 MiB
    scoped-VMEM limit requested below (and v7x's 64 MiB physical VMEM).  TR is
    a divisor of R so no block ever needs masking; when batch == 1 the
    row-block grid axis is forced to >= 2 steps for v7x's two TensorCores.
    """
    cap = _TARGET_BLOCK_BYTES // (c * 128 * elt_bytes)
    cap = max(8, min(2048, cap))
    tr = _largest_mult8_divisor(r, cap)
    if batch == 1 and r // tr < 2 and r > 8:
        tr = _largest_mult8_divisor(r, r // 2)
    return tr


def _pick_block_pixels(hw, c, batch, elt_bytes):
    """Pixels per grid step for the MXU kernel (pixels on sublanes)."""
    cap = _TARGET_BLOCK_BYTES // (c * elt_bytes)
    cap = max(256, min(8192, (cap // 256) * 256))
    tm = min(cap, _round_up(hw, 256))
    tm = max(256, (tm // 256) * 256)
    if batch == 1 and _round_up(hw, tm) // tm < 2 and tm > 256:
        tm = max(256, ((tm // 2) // 256) * 256)
    return tm


# ---------------------------------------------------------------------------
# VPU kernel: small channel counts (the synthetic head), pixels on lanes.
# ---------------------------------------------------------------------------
def _seg_argmax_vpu_kernel(x_ref, w_ref, b_ref, o_ref, *, compute_dtype):
    """Fused 1x1-conv + argmax over classes (VPU path, pixels-on-lanes).

    x_ref: (C, TR, 128)  activations, pixels on (sublane, lane) axes    [VMEM]
    w_ref: (C*K,)        1x1-conv weights, flat (no 2-D SMEM padding)   [SMEM]
    b_ref: (K,)          bias                                           [SMEM]
    o_ref: (TR, 128)     per-pixel class index (int32 / int8)           [VMEM]
    """
    C, TR, L = x_ref.shape
    K = b_ref.shape[0]

    # Prologue: hoist every SMEM scalar read (and its cast) out of the slab
    # loops; JAX does not CSE these, so leaving them inside re-issues ~C*K
    # scalar loads per row-band iteration.  The per-use scalar->vector splat
    # and the per-class index remain compile-time immediates (no SMEM reads).
    w = [[w_ref[c * K + k].astype(compute_dtype) for k in range(K)]
         for c in range(C)]
    b = [b_ref[k].astype(compute_dtype) for k in range(K)]

    # Slab rows scale down with C so live x-vregs (~C*TRC/8) plus ~12 working
    # vregs stay under ~48 of the 64 vregs across the unrolled K-class loop.
    if C <= 8:
        TRC = min(TR, 32)
    elif C <= 16:
        TRC = min(TR, 16)
    else:
        TRC = min(TR, 8)

    def do_slab(r0, nr):
        xs = x_ref[:, pl.ds(r0, nr), :].astype(compute_dtype)   # (C, nr, 128)

        # Class 0 seeds the running max -> ties resolve to the first maximal
        # index, matching jnp.argmax / the reference.
        best_v = xs[0] * w[0][0]
        for c in range(1, C):
            best_v = best_v + xs[c] * w[c][0]
        best_v = best_v + b[0]
        best_i = jnp.zeros((nr, L), jnp.int32)

        for k in range(1, K):
            logit = xs[0] * w[0][k]
            for c in range(1, C):
                logit = logit + xs[c] * w[c][k]
            logit = logit + b[k]
            take = logit > best_v                   # strict > keeps first max
            best_v = jnp.where(take, logit, best_v)
            best_i = jnp.where(take, k, best_i)

        # Lane-dense 128-wide store (unmasked vst).
        o_ref[pl.ds(r0, nr), :] = best_i.astype(o_ref.dtype)

    nfr, rem = TR // TRC, TR % TRC
    if nfr == 1:
        do_slab(0, TRC)
    elif nfr > 1:
        # Modest unroll: cross-slab visibility for the LLO scheduler without
        # code-size / vreg blow-up.
        if nfr <= 4:
            unroll = True
        elif nfr % 4 == 0:
            unroll = 4
        elif nfr % 2 == 0:
            unroll = 2
        else:
            unroll = 1

        def row_body(i, carry):
            do_slab(pl.multiple_of(i * TRC, 8), TRC)
            return carry

        lax.fori_loop(0, nfr, row_body, 0, unroll=unroll)
    if rem:
        do_slab(nfr * TRC, rem)


# ---------------------------------------------------------------------------
# MXU kernel: wide channel counts (C >= 32), channels on lanes.
# ---------------------------------------------------------------------------
def _seg_argmax_mxu_kernel(x_ref, w_ref, b_ref, o_ref):
    """Fused 1x1-conv + argmax for wide heads (MXU path).

    x_ref: (TM, C)    pixels on sublanes, channels on lanes             [VMEM]
    w_ref: (C, 128)   weights, classes padded to a full 128-lane tile   [VMEM]
    b_ref: (1, 128)   bias; padded classes carry -1e30                  [VMEM]
    o_ref: (TM, 1)    per-pixel class index                             [VMEM]
    """
    TM, C = x_ref.shape
    KP = w_ref.shape[1]

    # bf16 activations keep the MXU on its fast bf16 path; f32 stays f32.
    w = w_ref[...].astype(x_ref.dtype)
    b = b_ref[...]

    chunk = min(TM, _MXU_CHUNK_ROWS)
    nch = TM // chunk          # TM is a multiple of chunk by construction

    def do_chunk(r0):
        xs = x_ref[pl.ds(r0, chunk), :]                            # (chunk, C)
        logits = jnp.dot(xs, w, preferred_element_type=jnp.float32) + b
        m = jnp.max(logits, axis=-1, keepdims=True)
        lane = lax.broadcasted_iota(jnp.int32, logits.shape, 1)
        idx = jnp.min(jnp.where(logits == m, lane, KP),
                      axis=-1, keepdims=True)
        # Index writeback is ~1/C of the input read traffic in this regime, so
        # the width-1 store is not the bottleneck here.
        o_ref[pl.ds(r0, chunk), :] = idx.astype(o_ref.dtype)

    if nch == 1:
        do_chunk(0)
    else:
        if nch <= 8:
            unroll = True
        elif nch % 4 == 0:
            unroll = 4
        elif nch % 2 == 0:
            unroll = 2
        else:
            unroll = 1

        def body(i, carry):
            do_chunk(pl.multiple_of(i * chunk, chunk))
            return carry

        lax.fori_loop(0, nch, body, 0, unroll=unroll)


# ---------------------------------------------------------------------------
# Wrappers
# ---------------------------------------------------------------------------
def _forward_vpu(x_nchw, weight, bias, *, compute_dtype, out_dtype):
    B, C, H, W = x_nchw.shape
    K = weight.shape[1]
    HW = H * W
    elt = jnp.dtype(x_nchw.dtype).itemsize

    # Pixels always land on full (8,128) sublane/lane tiles: pad the flattened
    # pixel axis to a multiple of 1024 (one cheap HBM-bound pad; padded pixels
    # are computed and then sliced off).  No transpose: NCHW is channel-major,
    # so pixels go straight onto the sublane x lane axes.
    hw_pad = _round_up(HW, 1024)
    x3 = x_nchw.reshape(B, C, HW)
    if hw_pad != HW:
        x3 = jnp.pad(x3, ((0, 0), (0, 0), (0, hw_pad - HW)))
    R = hw_pad // 128
    x4 = x3.reshape(B, C, R, 128)

    TR = _pick_block_rows(R, C, B, elt)
    nblk = R // TR

    # Flat 1-D SMEM weights: a 2-D (C, K) SMEM array pads to (ceil(C/8)*8, 128)
    # words; flattening avoids the blow-up at realistic channel widths.
    w_flat = weight.astype(jnp.float32).reshape(C * K)
    b_vec = bias.astype(jnp.float32)

    kernel = functools.partial(_seg_argmax_vpu_kernel,
                               compute_dtype=compute_dtype)
    out = pl.pallas_call(
        kernel,
        out_shape=jax.ShapeDtypeStruct((B, R, 128), out_dtype),
        grid_spec=pltpu.PrefetchScalarGridSpec(
            num_scalar_prefetch=0,
            grid=(B, nblk),
            in_specs=[
                # Large activation tile: (C, TR, 128) pixels per grid step.
                pl.BlockSpec((None, C, TR, 128), lambda b, j: (b, 0, j, 0)),
                # Tiny 1x1-conv weights / bias live in SMEM as scalars.
                pl.BlockSpec(memory_space=pltpu.MemorySpace.SMEM),
                pl.BlockSpec(memory_space=pltpu.MemorySpace.SMEM),
            ],
            out_specs=pl.BlockSpec((None, TR, 128), lambda b, j: (b, j, 0)),
        ),
        compiler_params=pltpu.CompilerParams(
            dimension_semantics=("parallel", "parallel"),
            vmem_limit_bytes=_VMEM_LIMIT_BYTES,
        ),
    )(x4, w_flat, b_vec)

    idx = out.reshape(B, hw_pad)[:, :HW].reshape(B, H, W)
    # torch: out.argmax(1).squeeze() removes all size-1 dims (e.g. batch=1).
    return jnp.squeeze(idx)


def _forward_mxu(x_nchw, weight, bias, *, out_dtype):
    B, C, H, W = x_nchw.shape
    K = weight.shape[1]
    HW = H * W
    elt = jnp.dtype(x_nchw.dtype).itemsize

    # Channels-on-lanes layout for the MXU: one XLA HBM transpose, amortized
    # against the O(C*K) contraction the MXU then handles off the VPU.
    x_pc = x_nchw.reshape(B, C, HW).transpose(0, 2, 1)            # (B, HW, C)

    TM = _pick_block_pixels(HW, C, B, elt)
    p_pad = _round_up(HW, TM)
    if p_pad != HW:
        x_pc = jnp.pad(x_pc, ((0, 0), (0, p_pad - HW), (0, 0)))
    nblk = p_pad // TM

    # Classes padded to a full 128-lane tile; padded classes get bias -1e30 so
    # the lane argmax can never select them.
    KP = 128
    w_pad = jnp.zeros((C, KP), jnp.float32).at[:, :K].set(
        weight.astype(jnp.float32))
    b_pad = jnp.full((1, KP), -1e30, jnp.float32).at[0, :K].set(
        bias.astype(jnp.float32))

    out = pl.pallas_call(
        _seg_argmax_mxu_kernel,
        out_shape=jax.ShapeDtypeStruct((B, p_pad, 1), out_dtype),
        grid_spec=pltpu.PrefetchScalarGridSpec(
            num_scalar_prefetch=0,
            grid=(B, nblk),
            in_specs=[
                pl.BlockSpec((None, TM, C), lambda b, j: (b, j, 0)),
                pl.BlockSpec((C, KP), lambda b, j: (0, 0)),
                pl.BlockSpec((1, KP), lambda b, j: (0, 0)),
            ],
            out_specs=pl.BlockSpec((None, TM, 1), lambda b, j: (b, j, 0)),
        ),
        compiler_params=pltpu.CompilerParams(
            dimension_semantics=("parallel", "parallel"),
            vmem_limit_bytes=_VMEM_LIMIT_BYTES,
        ),
    )(x_pc, w_pad, b_pad)

    idx = out[:, :HW, 0].reshape(B, H, W)
    return jnp.squeeze(idx)


def dummy_lip_forward(x_nchw, weight, bias, *, compute_dtype=jnp.float32,
                      out_dtype=jnp.int32):
    """Reproduces DummyLIPModel.forward on the synthetic 1x1-conv head.

    x_nchw: [B, C, H, W] float32 (or bfloat16 to halve input HBM traffic)
    weight: [C, K] 1x1-conv weights, bias: [K]
    compute_dtype: pass jnp.bfloat16 on v6e/v7x to ~2x the VPU path (near-tie
        pixels may differ from f32); keep float32 on v5e (no bf16 VPU).
    out_dtype: pass jnp.int8 on bandwidth-poor v5e (classes 0..19 fit) to cut
        writeback 4x; int32 is the robust default.
    returns: per-pixel class-index map, jnp.squeeze of (B, H, W).
    """
    B, C, H, W = x_nchw.shape
    if C >= _MIN_MXU_CHANNELS:
        return _forward_mxu(x_nchw, weight, bias, out_dtype=out_dtype)
    return _forward_vpu(x_nchw, weight, bias, compute_dtype=compute_dtype,
                        out_dtype=out_dtype)


def _ref_logits(x, w, b):
    """Pure-JAX logits of the synthetic head, mirroring the VPU kernel's f32
    accumulation order (ascending c, then + bias) so exact-match is valid."""
    C = x.shape[1]
    K = w.shape[1]
    per_class = []
    for k in range(K):
        l = x[:, 0] * w[0, k]
        for c in range(1, C):
            l = l + x[:, c] * w[c, k]
        per_class.append(l + b[k])
    return jnp.stack(per_class, axis=1)                       # (B, K, H, W)


if __name__ == "__main__":
    key = jax.random.PRNGKey(0)
    k1, k2, k3, k4, k5, k6 = jax.random.split(key, 6)

    # 1. Primary demo: small NCHW batch through the VPU path (exact match).
    B, C, H, W = 2, 4, 16, 16
    x = jax.random.normal(k1, (B, C, H, W), dtype=jnp.float32)
    weight = jax.random.normal(k2, (C, NUM_CLASSES), dtype=jnp.float32)
    bias = jax.random.normal(k3, (NUM_CLASSES,), dtype=jnp.float32) * 0.1

    out = jax.block_until_ready(dummy_lip_forward(x, weight, bias))
    ref = jnp.squeeze(jnp.argmax(_ref_logits(x, weight, bias),
                                 axis=1).astype(jnp.int32))
    assert out.shape == ref.shape, (out.shape, ref.shape)
    assert bool(jnp.all(out == ref)), "VPU path mismatch vs reference"

    # 2. Non-128-aligned pixel count: exercises the pad-to-(8,128) path.
    x2 = jax.random.normal(k4, (1, 4, 23, 31), dtype=jnp.float32)
    out2 = jax.block_until_ready(dummy_lip_forward(x2, weight, bias))
    ref2 = jnp.squeeze(jnp.argmax(_ref_logits(x2, weight, bias),
                                  axis=1).astype(jnp.int32))
    assert out2.shape == ref2.shape, (out2.shape, ref2.shape)
    assert bool(jnp.all(out2 == ref2)), "padded VPU path mismatch vs reference"

    # 3. Wide-channel head -> MXU path.  MXU f32 accumulation order differs
    #    from the sequential reference, so check the chosen class is within
    #    1e-3 of the max reference logit instead of bit-exact argmax.
    C3 = 32
    x3 = jax.random.normal(k5, (1, C3, 32, 32), dtype=jnp.float32)
    w3 = jax.random.normal(k6, (C3, NUM_CLASSES), dtype=jnp.float32) * 0.25
    b3 = jnp.linspace(-0.5, 0.5, NUM_CLASSES, dtype=jnp.float32)
    out3 = jax.block_until_ready(dummy_lip_forward(x3, w3, b3))
    assert out3.shape == (32, 32), out3.shape
    logits3 = _ref_logits(x3, w3, b3)[0]                       # (K, H, W)
    chosen = jnp.take_along_axis(logits3, out3[None].astype(jnp.int32),
                                 axis=0)[0]
    assert bool(jnp.all(chosen >= jnp.max(logits3, axis=0) - 1e-3)), \
        "MXU path mismatch vs reference"

    print("KERNEL_OK")
</pallas_src>

<mosaic_0001>
module attributes {stable_mosaic.version = 11 : i64} {
  func.func @_seg_argmax_vpu_kernel(%arg0: i32, %arg1: i32, %arg2: memref<1x4x8x128xf32, #tpu.memory_space<vmem>>, %arg3: memref<80xf32, #tpu.memory_space<smem>>, %arg4: memref<20xf32, #tpu.memory_space<smem>>, %arg5: memref<1x8x128xi32, #tpu.memory_space<vmem>>) attributes {dimension_semantics = [#tpu.dimension_semantics<parallel>, #tpu.dimension_semantics<parallel>], iteration_bounds = array<i64: 2, 1>, scalar_prefetch = 0 : i64, scratch_operands = 0 : i64, tpu.core_type = #tpu.core_type<tc>, window_params = [{transform_indices = @transform_0, window_bounds = array<i64: 1, 4, 8, 128>}, {transform_indices = @transform_1, window_bounds = array<i64: 80>}, {transform_indices = @transform_2, window_bounds = array<i64: 20>}, {transform_indices = @transform_3, window_bounds = array<i64: 1, 8, 128>}]} {
    %c0 = arith.constant 0 : index
    %0 = memref.load %arg3[%c0] : memref<80xf32, #tpu.memory_space<smem>>
    %c1 = arith.constant 1 : index
    %1 = memref.load %arg3[%c1] : memref<80xf32, #tpu.memory_space<smem>>
    %c2 = arith.constant 2 : index
    %2 = memref.load %arg3[%c2] : memref<80xf32, #tpu.memory_space<smem>>
    %c3 = arith.constant 3 : index
    %3 = memref.load %arg3[%c3] : memref<80xf32, #tpu.memory_space<smem>>
    %c4 = arith.constant 4 : index
    %4 = memref.load %arg3[%c4] : memref<80xf32, #tpu.memory_space<smem>>
    %c5 = arith.constant 5 : index
    %5 = memref.load %arg3[%c5] : memref<80xf32, #tpu.memory_space<smem>>
    %c6 = arith.constant 6 : index
    %6 = memref.load %arg3[%c6] : memref<80xf32, #tpu.memory_space<smem>>
    %c7 = arith.constant 7 : index
    %7 = memref.load %arg3[%c7] : memref<80xf32, #tpu.memory_space<smem>>
    %c8 = arith.constant 8 : index
    %8 = memref.load %arg3[%c8] : memref<80xf32, #tpu.memory_space<smem>>
    %c9 = arith.constant 9 : index
    %9 = memref.load %arg3[%c9] : memref<80xf32, #tpu.memory_space<smem>>
    %c10 = arith.constant 10 : index
    %10 = memref.load %arg3[%c10] : memref<80xf32, #tpu.memory_space<smem>>
    %c11 = arith.constant 11 : index
    %11 = memref.load %arg3[%c11] : memref<80xf32, #tpu.memory_space<smem>>
    %c12 = arith.constant 12 : index
    %12 = memref.load %arg3[%c12] : memref<80xf32, #tpu.memory_space<smem>>
    %c13 = arith.constant 13 : index
    %13 = memref.load %arg3[%c13] : memref<80xf32, #tpu.memory_space<smem>>
    %c14 = arith.constant 14 : index
    %14 = memref.load %arg3[%c14] : memref<80xf32, #tpu.memory_space<smem>>
    %c15 = arith.constant 15 : index
    %15 = memref.load %arg3[%c15] : memref<80xf32, #tpu.memory_space<smem>>
    %c16 = arith.constant 16 : index
    %16 = memref.load %arg3[%c16] : memref<80xf32, #tpu.memory_space<smem>>
    %c17 = arith.constant 17 : index
    %17 = memref.load %arg3[%c17] : memref<80xf32, #tpu.memory_space<smem>>
    %c18 = arith.constant 18 : index
    %18 = memref.load %arg3[%c18] : memref<80xf32, #tpu.memory_space<smem>>
    %c19 = arith.constant 19 : index
    %19 = memref.load %arg3[%c19] : memref<80xf32, #tpu.memory_space<smem>>
    %c20 = arith.constant 20 : index
    %20 = memref.load %arg3[%c20] : memref<80xf32, #tpu.memory_space<smem>>
    %c21 = arith.constant 21 : index
    %21 = memref.load %arg3[%c21] : memref<80xf32, #tpu.memory_space<smem>>
    %c22 = arith.constant 22 : index
    %22 = memref.load %arg3[%c22] : memref<80xf32, #tpu.memory_space<smem>>
    %c23 = arith.constant 23 : index
    %23 = memref.load %arg3[%c23] : memref<80xf32, #tpu.memory_space<smem>>
    %c24 = arith.constant 24 : index
    %24 = memref.load %arg3[%c24] : memref<80xf32, #tpu.memory_space<smem>>
    %c25 = arith.constant 25 : index
    %25 = memref.load %arg3[%c25] : memref<80xf32, #tpu.memory_space<smem>>
    %c26 = arith.constant 26 : index
    %26 = memref.load %arg3[%c26] : memref<80xf32, #tpu.memory_space<smem>>
    %c27 = arith.constant 27 : index
    %27 = memref.load %arg3[%c27] : memref<80xf32, #tpu.memory_space<smem>>
    %c28 = arith.constant 28 : index
    %28 = memref.load %arg3[%c28] : memref<80xf32, #tpu.memory_space<smem>>
    %c29 = arith.constant 29 : index
    %29 = memref.load %arg3[%c29] : memref<80xf32, #tpu.memory_space<smem>>
    %c30 = arith.constant 30 : index
    %30 = memref.load %arg3[%c30] : memref<80xf32, #tpu.memory_space<smem>>
    %c31 = arith.constant 31 : index
    %31 = memref.load %arg3[%c31] : memref<80xf32, #tpu.memory_space<smem>>
    %c32 = arith.constant 32 : index
    %32 = memref.load %arg3[%c32] : memref<80xf32, #tpu.memory_space<smem>>
    %c33 = arith.constant 33 : index
    %33 = memref.load %arg3[%c33] : memref<80xf32, #tpu.memory_space<smem>>
    %c34 = arith.constant 34 : index
    %34 = memref.load %arg3[%c34] : memref<80xf32, #tpu.memory_space<smem>>
    %c35 = arith.constant 35 : index
    %35 = memref.load %arg3[%c35] : memref<80xf32, #tpu.memory_space<smem>>
    %c36 = arith.constant 36 : index
    %36 = memref.load %arg3[%c36] : memref<80xf32, #tpu.memory_space<smem>>
    %c37 = arith.constant 37 : index
    %37 = memref.load %arg3[%c37] : memref<80xf32, #tpu.memory_space<smem>>
    %c38 = arith.constant 38 : index
    %38 = memref.load %arg3[%c38] : memref<80xf32, #tpu.memory_space<smem>>
    %c39 = arith.constant 39 : index
    %39 = memref.load %arg3[%c39] : memref<80xf32, #tpu.memory_space<smem>>
    %c40 = arith.constant 40 : index
    %40 = memref.load %arg3[%c40] : memref<80xf32, #tpu.memory_space<smem>>
    %c41 = arith.constant 41 : index
    %41 = memref.load %arg3[%c41] : memref<80xf32, #tpu.memory_space<smem>>
    %c42 = arith.constant 42 : index
    %42 = memref.load %arg3[%c42] : memref<80xf32, #tpu.memory_space<smem>>
    %c43 = arith.constant 43 : index
    %43 = memref.load %arg3[%c43] : memref<80xf32, #tpu.memory_space<smem>>
    %c44 = arith.constant 44 : index
    %44 = memref.load %arg3[%c44] : memref<80xf32, #tpu.memory_space<smem>>
    %c45 = arith.constant 45 : index
    %45 = memref.load %arg3[%c45] : memref<80xf32, #tpu.memory_space<smem>>
    %c46 = arith.constant 46 : index
    %46 = memref.load %arg3[%c46] : memref<80xf32, #tpu.memory_space<smem>>
    %c47 = arith.constant 47 : index
    %47 = memref.load %arg3[%c47] : memref<80xf32, #tpu.memory_space<smem>>
    %c48 = arith.constant 48 : index
    %48 = memref.load %arg3[%c48] : memref<80xf32, #tpu.memory_space<smem>>
    %c49 = arith.constant 49 : index
    %49 = memref.load %arg3[%c49] : memref<80xf32, #tpu.memory_space<smem>>
    %c50 = arith.constant 50 : index
    %50 = memref.load %arg3[%c50] : memref<80xf32, #tpu.memory_space<smem>>
    %c51 = arith.constant 51 : index
    %51 = memref.load %arg3[%c51] : memref<80xf32, #tpu.memory_space<smem>>
    %c52 = arith.constant 52 : index
    %52 = memref.load %arg3[%c52] : memref<80xf32, #tpu.memory_space<smem>>
    %c53 = arith.constant 53 : index
    %53 = memref.load %arg3[%c53] : memref<80xf32, #tpu.memory_space<smem>>
    %c54 = arith.constant 54 : index
    %54 = memref.load %arg3[%c54] : memref<80xf32, #tpu.memory_space<smem>>
    %c55 = arith.constant 55 : index
    %55 = memref.load %arg3[%c55] : memref<80xf32, #tpu.memory_space<smem>>
    %c56 = arith.constant 56 : index
    %56 = memref.load %arg3[%c56] : memref<80xf32, #tpu.memory_space<smem>>
    %c57 = arith.constant 57 : index
    %57 = memref.load %arg3[%c57] : memref<80xf32, #tpu.memory_space<smem>>
    %c58 = arith.constant 58 : index
    %58 = memref.load %arg3[%c58] : memref<80xf32, #tpu.memory_space<smem>>
    %c59 = arith.constant 59 : index
    %59 = memref.load %arg3[%c59] : memref<80xf32, #tpu.memory_space<smem>>
    %c60 = arith.constant 60 : index
    %60 = memref.load %arg3[%c60] : memref<80xf32, #tpu.memory_space<smem>>
    %c61 = arith.constant 61 : index
    %61 = memref.load %arg3[%c61] : memref<80xf32, #tpu.memory_space<smem>>
    %c62 = arith.constant 62 : index
    %62 = memref.load %arg3[%c62] : memref<80xf32, #tpu.memory_space<smem>>
    %c63 = arith.constant 63 : index
    %63 = memref.load %arg3[%c63] : memref<80xf32, #tpu.memory_space<smem>>
    %c64 = arith.constant 64 : index
    %64 = memref.load %arg3[%c64] : memref<80xf32, #tpu.memory_space<smem>>
    %c65 = arith.constant 65 : index
    %65 = memref.load %arg3[%c65] : memref<80xf32, #tpu.memory_space<smem>>
    %c66 = arith.constant 66 : index
    %66 = memref.load %arg3[%c66] : memref<80xf32, #tpu.memory_space<smem>>
    %c67 = arith.constant 67 : index
    %67 = memref.load %arg3[%c67] : memref<80xf32, #tpu.memory_space<smem>>
    %c68 = arith.constant 68 : index
    %68 = memref.load %arg3[%c68] : memref<80xf32, #tpu.memory_space<smem>>
    %c69 = arith.constant 69 : index
    %69 = memref.load %arg3[%c69] : memref<80xf32, #tpu.memory_space<smem>>
    %c70 = arith.constant 70 : index
    %70 = memref.load %arg3[%c70] : memref<80xf32, #tpu.memory_space<smem>>
    %c71 = arith.constant 71 : index
    %71 = memref.load %arg3[%c71] : memref<80xf32, #tpu.memory_space<smem>>
    %c72 = arith.constant 72 : index
    %72 = memref.load %arg3[%c72] : memref<80xf32, #tpu.memory_space<smem>>
    %c73 = arith.constant 73 : index
    %73 = memref.load %arg3[%c73] : memref<80xf32, #tpu.memory_space<smem>>
    %c74 = arith.constant 74 : index
    %74 = memref.load %arg3[%c74] : memref<80xf32, #tpu.memory_space<smem>>
    %c75 = arith.constant 75 : index
    %75 = memref.load %arg3[%c75] : memref<80xf32, #tpu.memory_space<smem>>
    %c76 = arith.constant 76 : index
    %76 = memref.load %arg3[%c76] : memref<80xf32, #tpu.memory_space<smem>>
    %c77 = arith.constant 77 : index
    %77 = memref.load %arg3[%c77] : memref<80xf32, #tpu.memory_space<smem>>
    %c78 = arith.constant 78 : index
    %78 = memref.load %arg3[%c78] : memref<80xf32, #tpu.memory_space<smem>>
    %c79 = arith.constant 79 : index
    %79 = memref.load %arg3[%c79] : memref<80xf32, #tpu.memory_space<smem>>
    %c0_0 = arith.constant 0 : index
    %80 = memref.load %arg4[%c0_0] : memref<20xf32, #tpu.memory_space<smem>>
    %c1_1 = arith.constant 1 : index
    %81 = memref.load %arg4[%c1_1] : memref<20xf32, #tpu.memory_space<smem>>
    %c2_2 = arith.constant 2 : index
    %82 = memref.load %arg4[%c2_2] : memref<20xf32, #tpu.memory_space<smem>>
    %c3_3 = arith.constant 3 : index
    %83 = memref.load %arg4[%c3_3] : memref<20xf32, #tpu.memory_space<smem>>
    %c4_4 = arith.constant 4 : index
    %84 = memref.load %arg4[%c4_4] : memref<20xf32, #tpu.memory_space<smem>>
    %c5_5 = arith.constant 5 : index
    %85 = memref.load %arg4[%c5_5] : memref<20xf32, #tpu.memory_space<smem>>
    %c6_6 = arith.constant 6 : index
    %86 = memref.load %arg4[%c6_6] : memref<20xf32, #tpu.memory_space<smem>>
    %c7_7 = arith.constant 7 : index
    %87 = memref.load %arg4[%c7_7] : memref<20xf32, #tpu.memory_space<smem>>
    %c8_8 = arith.constant 8 : index
    %88 = memref.load %arg4[%c8_8] : memref<20xf32, #tpu.memory_space<smem>>
    %c9_9 = arith.constant 9 : index
    %89 = memref.load %arg4[%c9_9] : memref<20xf32, #tpu.memory_space<smem>>
    %c10_10 = arith.constant 10 : index
    %90 = memref.load %arg4[%c10_10] : memref<20xf32, #tpu.memory_space<smem>>
    %c11_11 = arith.constant 11 : index
    %91 = memref.load %arg4[%c11_11] : memref<20xf32, #tpu.memory_space<smem>>
    %c12_12 = arith.constant 12 : index
    %92 = memref.load %arg4[%c12_12] : memref<20xf32, #tpu.memory_space<smem>>
    %c13_13 = arith.constant 13 : index
    %93 = memref.load %arg4[%c13_13] : memref<20xf32, #tpu.memory_space<smem>>
    %c14_14 = arith.constant 14 : index
    %94 = memref.load %arg4[%c14_14] : memref<20xf32, #tpu.memory_space<smem>>
    %c15_15 = arith.constant 15 : index
    %95 = memref.load %arg4[%c15_15] : memref<20xf32, #tpu.memory_space<smem>>
    %c16_16 = arith.constant 16 : index
    %96 = memref.load %arg4[%c16_16] : memref<20xf32, #tpu.memory_space<smem>>
    %c17_17 = arith.constant 17 : index
    %97 = memref.load %arg4[%c17_17] : memref<20xf32, #tpu.memory_space<smem>>
    %c18_18 = arith.constant 18 : index
    %98 = memref.load %arg4[%c18_18] : memref<20xf32, #tpu.memory_space<smem>>
    %c19_19 = arith.constant 19 : index
    %99 = memref.load %arg4[%c19_19] : memref<20xf32, #tpu.memory_space<smem>>
    %c0_20 = arith.constant 0 : index
    %c0_21 = arith.constant 0 : index
    %c0_22 = arith.constant 0 : index
    %c0_23 = arith.constant 0 : index
    %100 = vector.load %arg2[%c0_20, %c0_21, %c0_22, %c0_23] : memref<1x4x8x128xf32, #tpu.memory_space<vmem>>, vector<1x4x8x128xf32>
    %101 = vector.shape_cast %100 : vector<1x4x8x128xf32> to vector<4x8x128xf32>
    %102 = vector.extract_strided_slice %101 {offsets = [0, 0, 0], sizes = [1, 8, 128], strides = [1, 1, 1]} : vector<4x8x128xf32> to vector<1x8x128xf32>
    %103 = vector.shape_cast %102 : vector<1x8x128xf32> to vector<8x128xf32>
    %104 = vector.broadcast %0 : f32 to vector<8x128xf32>
    %105 = arith.mulf %103, %104 : vector<8x128xf32>
    %106 = vector.extract_strided_slice %101 {offsets = [1, 0, 0], sizes = [1, 8, 128], strides = [1, 1, 1]} : vector<4x8x128xf32> to vector<1x8x128xf32>
    %107 = vector.shape_cast %106 : vector<1x8x128xf32> to vector<8x128xf32>
    %108 = vector.broadcast %20 : f32 to vector<8x128xf32>
    %109 = arith.mulf %107, %108 : vector<8x128xf32>
    %110 = arith.addf %105, %109 : vector<8x128xf32>
    %111 = vector.extract_strided_slice %101 {offsets = [2, 0, 0], sizes = [1, 8, 128], strides = [1, 1, 1]} : vector<4x8x128xf32> to vector<1x8x128xf32>
    %112 = vector.shape_cast %111 : vector<1x8x128xf32> to vector<8x128xf32>
    %113 = vector.broadcast %40 : f32 to vector<8x128xf32>
    %114 = arith.mulf %112, %113 : vector<8x128xf32>
    %115 = arith.addf %110, %114 : vector<8x128xf32>
    %116 = vector.extract_strided_slice %101 {offsets = [3, 0, 0], sizes = [1, 8, 128], strides = [1, 1, 1]} : vector<4x8x128xf32> to vector<1x8x128xf32>
    %117 = vector.shape_cast %116 : vector<1x8x128xf32> to vector<8x128xf32>
    %118 = vector.broadcast %60 : f32 to vector<8x128xf32>
    %119 = arith.mulf %117, %118 : vector<8x128xf32>
    %120 = arith.addf %115, %119 : vector<8x128xf32>
    %121 = vector.broadcast %80 : f32 to vector<8x128xf32>
    %122 = arith.addf %120, %121 : vector<8x128xf32>
    %c0_i32 = arith.constant 0 : i32
    %123 = vector.broadcast %c0_i32 : i32 to vector<8x128xi32>
    %124 = vector.extract_strided_slice %101 {offsets = [0, 0, 0], sizes = [1, 8, 128], strides = [1, 1, 1]} : vector<4x8x128xf32> to vector<1x8x128xf32>
    %125 = vector.shape_cast %124 : vector<1x8x128xf32> to vector<8x128xf32>
    %126 = vector.broadcast %1 : f32 to vector<8x128xf32>
    %127 = arith.mulf %125, %126 : vector<8x128xf32>
    %128 = vector.extract_strided_slice %101 {offsets = [1, 0, 0], sizes = [1, 8, 128], strides = [1, 1, 1]} : vector<4x8x128xf32> to vector<1x8x128xf32>
    %129 = vector.shape_cast %128 : vector<1x8x128xf32> to vector<8x128xf32>
    %130 = vector.broadcast %21 : f32 to vector<8x128xf32>
    %131 = arith.mulf %129, %130 : vector<8x128xf32>
    %132 = arith.addf %127, %131 : vector<8x128xf32>
    %133 = vector.extract_strided_slice %101 {offsets = [2, 0, 0], sizes = [1, 8, 128], strides = [1, 1, 1]} : vector<4x8x128xf32> to vector<1x8x128xf32>
    %134 = vector.shape_cast %133 : vector<1x8x128xf32> to vector<8x128xf32>
    %135 = vector.broadcast %41 : f32 to vector<8x128xf32>
    %136 = arith.mulf %134, %135 : vector<8x128xf32>
    %137 = arith.addf %132, %136 : vector<8x128xf32>
    %138 = vector.extract_strided_slice %101 {offsets = [3, 0, 0], sizes = [1, 8, 128], strides = [1, 1, 1]} : vector<4x8x128xf32> to vector<1x8x128xf32>
    %139 = vector.shape_cast %138 : vector<1x8x128xf32> to vector<8x128xf32>
    %140 = vector.broadcast %61 : f32 to vector<8x128xf32>
    %141 = arith.mulf %139, %140 : vector<8x128xf32>
    %142 = arith.addf %137, %141 : vector<8x128xf32>
    %143 = vector.broadcast %81 : f32 to vector<8x128xf32>
    %144 = arith.addf %142, %143 : vector<8x128xf32>
    %145 = arith.cmpf ogt, %144, %122 : vector<8x128xf32>
    %146 = arith.select %145, %144, %122 : vector<8x128xi1>, vector<8x128xf32>
    %c1_i32 = arith.constant 1 : i32
    %147 = vector.broadcast %c1_i32 : i32 to vector<8x128xi32>
    %148 = arith.select %145, %147, %123 : vector<8x128xi1>, vector<8x128xi32>
    %149 = vector.extract_strided_slice %101 {offsets = [0, 0, 0], sizes = [1, 8, 128], strides = [1, 1, 1]} : vector<4x8x128xf32> to vector<1x8x128xf32>
    %150 = vector.shape_cast %149 : vector<1x8x128xf32> to vector<8x128xf32>
    %151 = vector.broadcast %2 : f32 to vector<8x128xf32>
    %152 = arith.mulf %150, %151 : vector<8x128xf32>
    %153 = vector.extract_strided_slice %101 {offsets = [1, 0, 0], sizes = [1, 8, 128], strides = [1, 1, 1]} : vector<4x8x128xf32> to vector<1x8x128xf32>
    %154 = vector.shape_cast %153 : vector<1x8x128xf32> to vector<8x128xf32>
    %155 = vector.broadcast %22 : f32 to vector<8x128xf32>
    %156 = arith.mulf %154, %155 : vector<8x128xf32>
    %157 = arith.addf %152, %156 : vector<8x128xf32>
    %158 = vector.extract_strided_slice %101 {offsets = [2, 0, 0], sizes = [1, 8, 128], strides = [1, 1, 1]} : vector<4x8x128xf32> to vector<1x8x128xf32>
    %159 = vector.shape_cast %158 : vector<1x8x128xf32> to vector<8x128xf32>
    %160 = vector.broadcast %42 : f32 to vector<8x128xf32>
    %161 = arith.mulf %159, %160 : vector<8x128xf32>
    %162 = arith.addf %157, %161 : vector<8x128xf32>
    %163 = vector.extract_strided_slice %101 {offsets = [3, 0, 0], sizes = [1, 8, 128], strides = [1, 1, 1]} : vector<4x8x128xf32> to vector<1x8x128xf32>
    %164 = vector.shape_cast %163 : vector<1x8x128xf32> to vector<8x128xf32>
    %165 = vector.broadcast %62 : f32 to vector<8x128xf32>
    %166 = arith.mulf %164, %165 : vector<8x128xf32>
    %167 = arith.addf %162, %166 : vector<8x128xf32>
    %168 = vector.broadcast %82 : f32 to vector<8x128xf32>
    %169 = arith.addf %167, %168 : vector<8x128xf32>
    %170 = arith.cmpf ogt, %169, %146 : vector<8x128xf32>
    %171 = arith.select %170, %169, %146 : vector<8x128xi1>, vector<8x128xf32>
    %c2_i32 = arith.constant 2 : i32
    %172 = vector.broadcast %c2_i32 : i32 to vector<8x128xi32>
    %173 = arith.select %170, %172, %148 : vector<8x128xi1>, vector<8x128xi32>
    %174 = vector.extract_strided_slice %101 {offsets = [0, 0, 0], sizes = [1, 8, 128], strides = [1, 1, 1]} : vector<4x8x128xf32> to vector<1x8x128xf32>
    %175 = vector.shape_cast %174 : vector<1x8x128xf32> to vector<8x128xf32>
    %176 = vector.broadcast %3 : f32 to vector<8x128xf32>
    %177 = arith.mulf %175, %176 : vector<8x128xf32>
    %178 = vector.extract_strided_slice %101 {offsets = [1, 0, 0], sizes = [1, 8, 128], strides = [1, 1, 1]} : vector<4x8x128xf32> to vector<1x8x128xf32>
    %179 = vector.shape_cast %178 : vector<1x8x128xf32> to vector<8x128xf32>
    %180 = vector.broadcast %23 : f32 to vector<8x128xf32>
    %181 = arith.mulf %179, %180 : vector<8x128xf32>
    %182 = arith.addf %177, %181 : vector<8x128xf32>
    %183 = vector.extract_strided_slice %101 {offsets = [2, 0, 0], sizes = [1, 8, 128], strides = [1, 1, 1]} : vector<4x8x128xf32> to vector<1x8x128xf32>
    %184 = vector.shape_cast %183 : vector<1x8x128xf32> to vector<8x128xf32>
    %185 = vector.broadcast %43 : f32 to vector<8x128xf32>
    %186 = arith.mulf %184, %185 : vector<8x128xf32>
    %187 = arith.addf %182, %186 : vector<8x128xf32>
    %188 = vector.extract_strided_slice %101 {offsets = [3, 0, 0], sizes = [1, 8, 128], strides = [1, 1, 1]} : vector<4x8x128xf32> to vector<1x8x128xf32>
    %189 = vector.shape_cast %188 : vector<1x8x128xf32> to vector<8x128xf32>
    %190 = vector.broadcast %63 : f32 to vector<8x128xf32>
    %191 = arith.mulf %189, %190 : vector<8x128xf32>
    %192 = arith.addf %187, %191 : vector<8x128xf32>
    %193 = vector.broadcast %83 : f32 to vector<8x128xf32>
    %194 = arith.addf %192, %193 : vector<8x128xf32>
    %195 = arith.cmpf ogt, %194, %171 : vector<8x128xf32>
    %196 = arith.select %195, %194, %171 : vector<8x128xi1>, vector<8x128xf32>
    %c3_i32 = arith.constant 3 : i32
    %197 = vector.broadcast %c3_i32 : i32 to vector<8x128xi32>
    %198 = arith.select %195, %197, %173 : vector<8x128xi1>, vector<8x128xi32>
    %199 = vector.extract_strided_slice %101 {offsets = [0, 0, 0], sizes = [1, 8, 128], strides = [1, 1, 1]} : vector<4x8x128xf32> to vector<1x8x128xf32>
    %200 = vector.shape_cast %199 : vector<1x8x128xf32> to vector<8x128xf32>
    %201 = vector.broadcast %4 : f32 to vector<8x128xf32>
    %202 = arith.mulf %200, %201 : vector<8x128xf32>
    %203 = vector.extract_strided_slice %101 {offsets = [1, 0, 0], sizes = [1, 8, 128], strides = [1, 1, 1]} : vector<4x8x128xf32> to vector<1x8x128xf32>
    %204 = vector.shape_cast %203 : vector<1x8x128xf32> to vector<8x128xf32>
    %205 = vector.broadcast %24 : f32 to vector<8x128xf32>
    %206 = arith.mulf %204, %205 : vector<8x128xf32>
    %207 = arith.addf %202, %206 : vector<8x128xf32>
    %208 = vector.extract_strided_slice %101 {offsets = [2, 0, 0], sizes = [1, 8, 128], strides = [1, 1, 1]} : vector<4x8x128xf32> to vector<1x8x128xf32>
    %209 = vector.shape_cast %208 : vector<1x8x128xf32> to vector<8x128xf32>
    %210 = vector.broadcast %44 : f32 to vector<8x128xf32>
    %211 = arith.mulf %209, %210 : vector<8x128xf32>
    %212 = arith.addf %207, %211 : vector<8x128xf32>
    %213 = vector.extract_strided_slice %101 {offsets = [3, 0, 0], sizes = [1, 8, 128], strides = [1, 1, 1]} : vector<4x8x128xf32> to vector<1x8x128xf32>
    %214 = vector.shape_cast %213 : vector<1x8x128xf32> to vector<8x128xf32>
    %215 = vector.broadcast %64 : f32 to vector<8x128xf32>
    %216 = arith.mulf %214, %215 : vector<8x128xf32>
    %217 = arith.addf %212, %216 : vector<8x128xf32>
    %218 = vector.broadcast %84 : f32 to vector<8x128xf32>
    %219 = arith.addf %217, %218 : vector<8x128xf32>
    %220 = arith.cmpf ogt, %219, %196 : vector<8x128xf32>
    %221 = arith.select %220, %219, %196 : vector<8x128xi1>, vector<8x128xf32>
    %c4_i32 = arith.constant 4 : i32
    %222 = vector.broadcast %c4_i32 : i32 to vector<8x128xi32>
    %223 = arith.select %220, %222, %198 : vector<8x128xi1>, vector<8x128xi32>
    %224 = vector.extract_strided_slice %101 {offsets = [0, 0, 0], sizes = [1, 8, 128], strides = [1, 1, 1]} : vector<4x8x128xf32> to vector<1x8x128xf32>
    %225 = vector.shape_cast %224 : vector<1x8x128xf32> to vector<8x128xf32>
    %226 = vector.broadcast %5 : f32 to vector<8x128xf32>
    %227 = arith.mulf %225, %226 : vector<8x128xf32>
    %228 = vector.extract_strided_slice %101 {offsets = [1, 0, 0], sizes = [1, 8, 128], strides = [1, 1, 1]} : vector<4x8x128xf32> to vector<1x8x128xf32>
    %229 = vector.shape_cast %228 : vector<1x8x128xf32> to vector<8x128xf32>
    %230 = vector.broadcast %25 : f32 to vector<8x128xf32>
    %231 = arith.mulf %229, %230 : vector<8x128xf32>
    %232 = arith.addf %227, %231 : vector<8x128xf32>
    %233 = vector.extract_strided_slice %101 {offsets = [2, 0, 0], sizes = [1, 8, 128], strides = [1, 1, 1]} : vector<4x8x128xf32> to vector<1x8x128xf32>
    %234 = vector.shape_cast %233 : vector<1x8x128xf32> to vector<8x128xf32>
    %235 = vector.broadcast %45 : f32 to vector<8x128xf32>
    %236 = arith.mulf %234, %235 : vector<8x128xf32>
    %237 = arith.addf %232, %236 : vector<8x128xf32>
    %238 = vector.extract_strided_slice %101 {offsets = [3, 0, 0], sizes = [1, 8, 128], strides = [1, 1, 1]} : vector<4x8x128xf32> to vector<1x8x128xf32>
    %239 = vector.shape_cast %238 : vector<1x8x128xf32> to vector<8x128xf32>
    %240 = vector.broadcast %65 : f32 to vector<8x128xf32>
    %241 = arith.mulf %239, %240 : vector<8x128xf32>
    %242 = arith.addf %237, %241 : vector<8x128xf32>
    %243 = vector.broadcast %85 : f32 to vector<8x128xf32>
    %244 = arith.addf %242, %243 : vector<8x128xf32>
    %245 = arith.cmpf ogt, %244, %221 : vector<8x128xf32>
    %246 = arith.select %245, %244, %221 : vector<8x128xi1>, vector<8x128xf32>
    %c5_i32 = arith.constant 5 : i32
    %247 = vector.broadcast %c5_i32 : i32 to vector<8x128xi32>
    %248 = arith.select %245, %247, %223 : vector<8x128xi1>, vector<8x128xi32>
    %249 = vector.extract_strided_slice %101 {offsets = [0, 0, 0], sizes = [1, 8, 128], strides = [1, 1, 1]} : vector<4x8x128xf32> to vector<1x8x128xf32>
    %250 = vector.shape_cast %249 : vector<1x8x128xf32> to vector<8x128xf32>
    %251 = vector.broadcast %6 : f32 to vector<8x128xf32>
    %252 = arith.mulf %250, %251 : vector<8x128xf32>
    %253 = vector.extract_strided_slice %101 {offsets = [1, 0, 0], sizes = [1, 8, 128], strides = [1, 1, 1]} : vector<4x8x128xf32> to vector<1x8x128xf32>
    %254 = vector.shape_cast %253 : vector<1x8x128xf32> to vector<8x128xf32>
    %255 = vector.broadcast %26 : f32 to vector<8x128xf32>
    %256 = arith.mulf %254, %255 : vector<8x128xf32>
    %257 = arith.addf %252, %256 : vector<8x128xf32>
    %258 = vector.extract_strided_slice %101 {offsets = [2, 0, 0], sizes = [1, 8, 128], strides = [1, 1, 1]} : vector<4x8x128xf32> to vector<1x8x128xf32>
    %259 = vector.shape_cast %258 : vector<1x8x128xf32> to vector<8x128xf32>
    %260 = vector.broadcast %46 : f32 to vector<8x128xf32>
    %261 = arith.mulf %259, %260 : vector<8x128xf32>
    %262 = arith.addf %257, %261 : vector<8x128xf32>
    %263 = vector.extract_strided_slice %101 {offsets = [3, 0, 0], sizes = [1, 8, 128], strides = [1, 1, 1]} : vector<4x8x128xf32> to vector<1x8x128xf32>
    %264 = vector.shape_cast %263 : vector<1x8x128xf32> to vector<8x128xf32>
    %265 = vector.broadcast %66 : f32 to vector<8x128xf32>
    %266 = arith.mulf %264, %265 : vector<8x128xf32>
    %267 = arith.addf %262, %266 : vector<8x128xf32>
    %268 = vector.broadcast %86 : f32 to vector<8x128xf32>
    %269 = arith.addf %267, %268 : vector<8x128xf32>
    %270 = arith.cmpf ogt, %269, %246 : vector<8x128xf32>
    %271 = arith.select %270, %269, %246 : vector<8x128xi1>, vector<8x128xf32>
    %c6_i32 = arith.constant 6 : i32
    %272 = vector.broadcast %c6_i32 : i32 to vector<8x128xi32>
    %273 = arith.select %270, %272, %248 : vector<8x128xi1>, vector<8x128xi32>
    %274 = vector.extract_strided_slice %101 {offsets = [0, 0, 0], sizes = [1, 8, 128], strides = [1, 1, 1]} : vector<4x8x128xf32> to vector<1x8x128xf32>
    %275 = vector.shape_cast %274 : vector<1x8x128xf32> to vector<8x128xf32>
    %276 = vector.broadcast %7 : f32 to vector<8x128xf32>
    %277 = arith.mulf %275, %276 : vector<8x128xf32>
    %278 = vector.extract_strided_slice %101 {offsets = [1, 0, 0], sizes = [1, 8, 128], strides = [1, 1, 1]} : vector<4x8x128xf32> to vector<1x8x128xf32>
    %279 = vector.shape_cast %278 : vector<1x8x128xf32> to vector<8x128xf32>
    %280 = vector.broadcast %27 : f32 to vector<8x128xf32>
    %281 = arith.mulf %279, %280 : vector<8x128xf32>
    %282 = arith.addf %277, %281 : vector<8x128xf32>
    %283 = vector.extract_strided_slice %101 {offsets = [2, 0, 0], sizes = [1, 8, 128], strides = [1, 1, 1]} : vector<4x8x128xf32> to vector<1x8x128xf32>
    %284 = vector.shape_cast %283 : vector<1x8x128xf32> to vector<8x128xf32>
    %285 = vector.broadcast %47 : f32 to vector<8x128xf32>
    %286 = arith.mulf %284, %285 : vector<8x128xf32>
    %287 = arith.addf %282, %286 : vector<8x128xf32>
    %288 = vector.extract_strided_slice %101 {offsets = [3, 0, 0], sizes = [1, 8, 128], strides = [1, 1, 1]} : vector<4x8x128xf32> to vector<1x8x128xf32>
    %289 = vector.shape_cast %288 : vector<1x8x128xf32> to vector<8x128xf32>
    %290 = vector.broadcast %67 : f32 to vector<8x128xf32>
    %291 = arith.mulf %289, %290 : vector<8x128xf32>
    %292 = arith.addf %287, %291 : vector<8x128xf32>
    %293 = vector.broadcast %87 : f32 to vector<8x128xf32>
    %294 = arith.addf %292, %293 : vector<8x128xf32>
    %295 = arith.cmpf ogt, %294, %271 : vector<8x128xf32>
    %296 = arith.select %295, %294, %271 : vector<8x128xi1>, vector<8x128xf32>
    %c7_i32 = arith.constant 7 : i32
    %297 = vector.broadcast %c7_i32 : i32 to vector<8x128xi32>
    %298 = arith.select %295, %297, %273 : vector<8x128xi1>, vector<8x128xi32>
    %299 = vector.extract_strided_slice %101 {offsets = [0, 0, 0], sizes = [1, 8, 128], strides = [1, 1, 1]} : vector<4x8x128xf32> to vector<1x8x128xf32>
    %300 = vector.shape_cast %299 : vector<1x8x128xf32> to vector<8x128xf32>
    %301 = vector.broadcast %8 : f32 to vector<8x128xf32>
    %302 = arith.mulf %300, %301 : vector<8x128xf32>
    %303 = vector.extract_strided_slice %101 {offsets = [1, 0, 0], sizes = [1, 8, 128], strides = [1, 1, 1]} : vector<4x8x128xf32> to vector<1x8x128xf32>
    %304 = vector.shape_cast %303 : vector<1x8x128xf32> to vector<8x128xf32>
    %305 = vector.broadcast %28 : f32 to vector<8x128xf32>
    %306 = arith.mulf %304, %305 : vector<8x128xf32>
    %307 = arith.addf %302, %306 : vector<8x128xf32>
    %308 = vector.extract_strided_slice %101 {offsets = [2, 0, 0], sizes = [1, 8, 128], strides = [1, 1, 1]} : vector<4x8x128xf32> to vector<1x8x128xf32>
    %309 = vector.shape_cast %308 : vector<1x8x128xf32> to vector<8x128xf32>
    %310 = vector.broadcast %48 : f32 to vector<8x128xf32>
    %311 = arith.mulf %309, %310 : vector<8x128xf32>
    %312 = arith.addf %307, %311 : vector<8x128xf32>
    %313 = vector.extract_strided_slice %101 {offsets = [3, 0, 0], sizes = [1, 8, 128], strides = [1, 1, 1]} : vector<4x8x128xf32> to vector<1x8x128xf32>
    %314 = vector.shape_cast %313 : vector<1x8x128xf32> to vector<8x128xf32>
    %315 = vector.broadcast %68 : f32 to vector<8x128xf32>
    %316 = arith.mulf %314, %315 : vector<8x128xf32>
    %317 = arith.addf %312, %316 : vector<8x128xf32>
    %318 = vector.broadcast %88 : f32 to vector<8x128xf32>
    %319 = arith.addf %317, %318 : vector<8x128xf32>
    %320 = arith.cmpf ogt, %319, %296 : vector<8x128xf32>
    %321 = arith.select %320, %319, %296 : vector<8x128xi1>, vector<8x128xf32>
    %c8_i32 = arith.constant 8 : i32
    %322 = vector.broadcast %c8_i32 : i32 to vector<8x128xi32>
    %323 = arith.select %320, %322, %298 : vector<8x128xi1>, vector<8x128xi32>
    %324 = vector.extract_strided_slice %101 {offsets = [0, 0, 0], sizes = [1, 8, 128], strides = [1, 1, 1]} : vector<4x8x128xf32> to vector<1x8x128xf32>
    %325 = vector.shape_cast %324 : vector<1x8x128xf32> to vector<8x128xf32>
    %326 = vector.broadcast %9 : f32 to vector<8x128xf32>
    %327 = arith.mulf %325, %326 : vector<8x128xf32>
    %328 = vector.extract_strided_slice %101 {offsets = [1, 0, 0], sizes = [1, 8, 128], strides = [1, 1, 1]} : vector<4x8x128xf32> to vector<1x8x128xf32>
    %329 = vector.shape_cast %328 : vector<1x8x128xf32> to vector<8x128xf32>
    %330 = vector.broadcast %29 : f32 to vector<8x128xf32>
    %331 = arith.mulf %329, %330 : vector<8x128xf32>
    %332 = arith.addf %327, %331 : vector<8x128xf32>
    %333 = vector.extract_strided_slice %101 {offsets = [2, 0, 0], sizes = [1, 8, 128], strides = [1, 1, 1]} : vector<4x8x128xf32> to vector<1x8x128xf32>
    %334 = vector.shape_cast %333 : vector<1x8x128xf32> to vector<8x128xf32>
    %335 = vector.broadcast %49 : f32 to vector<8x128xf32>
    %336 = arith.mulf %334, %335 : vector<8x128xf32>
    %337 = arith.addf %332, %336 : vector<8x128xf32>
    %338 = vector.extract_strided_slice %101 {offsets = [3, 0, 0], sizes = [1, 8, 128], strides = [1, 1, 1]} : vector<4x8x128xf32> to vector<1x8x128xf32>
    %339 = vector.shape_cast %338 : vector<1x8x128xf32> to vector<8x128xf32>
    %340 = vector.broadcast %69 : f32 to vector<8x128xf32>
    %341 = arith.mulf %339, %340 : vector<8x128xf32>
    %342 = arith.addf %337, %341 : vector<8x128xf32>
    %343 = vector.broadcast %89 : f32 to vector<8x128xf32>
    %344 = arith.addf %342, %343 : vector<8x128xf32>
    %345 = arith.cmpf ogt, %344, %321 : vector<8x128xf32>
    %346 = arith.select %345, %344, %321 : vector<8x128xi1>, vector<8x128xf32>
    %c9_i32 = arith.constant 9 : i32
    %347 = vector.broadcast %c9_i32 : i32 to vector<8x128xi32>
    %348 = arith.select %345, %347, %323 : vector<8x128xi1>, vector<8x128xi32>
    %349 = vector.extract_strided_slice %101 {offsets = [0, 0, 0], sizes = [1, 8, 128], strides = [1, 1, 1]} : vector<4x8x128xf32> to vector<1x8x128xf32>
    %350 = vector.shape_cast %349 : vector<1x8x128xf32> to vector<8x128xf32>
    %351 = vector.broadcast %10 : f32 to vector<8x128xf32>
    %352 = arith.mulf %350, %351 : vector<8x128xf32>
    %353 = vector.extract_strided_slice %101 {offsets = [1, 0, 0], sizes = [1, 8, 128], strides = [1, 1, 1]} : vector<4x8x128xf32> to vector<1x8x128xf32>
    %354 = vector.shape_cast %353 : vector<1x8x128xf32> to vector<8x128xf32>
    %355 = vector.broadcast %30 : f32 to vector<8x128xf32>
    %356 = arith.mulf %354, %355 : vector<8x128xf32>
    %357 = arith.addf %352, %356 : vector<8x128xf32>
    %358 = vector.extract_strided_slice %101 {offsets = [2, 0, 0], sizes = [1, 8, 128], strides = [1, 1, 1]} : vector<4x8x128xf32> to vector<1x8x128xf32>
    %359 = vector.shape_cast %358 : vector<1x8x128xf32> to vector<8x128xf32>
    %360 = vector.broadcast %50 : f32 to vector<8x128xf32>
    %361 = arith.mulf %359, %360 : vector<8x128xf32>
    %362 = arith.addf %357, %361 : vector<8x128xf32>
    %363 = vector.extract_strided_slice %101 {offsets = [3, 0, 0], sizes = [1, 8, 128], strides = [1, 1, 1]} : vector<4x8x128xf32> to vector<1x8x128xf32>
    %364 = vector.shape_cast %363 : vector<1x8x128xf32> to vector<8x128xf32>
    %365 = vector.broadcast %70 : f32 to vector<8x128xf32>
    %366 = arith.mulf %364, %365 : vector<8x128xf32>
    %367 = arith.addf %362, %366 : vector<8x128xf32>
    %368 = vector.broadcast %90 : f32 to vector<8x128xf32>
    %369 = arith.addf %367, %368 : vector<8x128xf32>
    %370 = arith.cmpf ogt, %369, %346 : vector<8x128xf32>
    %371 = arith.select %370, %369, %346 : vector<8x128xi1>, vector<8x128xf32>
    %c10_i32 = arith.constant 10 : i32
    %372 = vector.broadcast %c10_i32 : i32 to vector<8x128xi32>
    %373 = arith.select %370, %372, %348 : vector<8x128xi1>, vector<8x128xi32>
    %374 = vector.extract_strided_slice %101 {offsets = [0, 0, 0], sizes = [1, 8, 128], strides = [1, 1, 1]} : vector<4x8x128xf32> to vector<1x8x128xf32>
    %375 = vector.shape_cast %374 : vector<1x8x128xf32> to vector<8x128xf32>
    %376 = vector.broadcast %11 : f32 to vector<8x128xf32>
    %377 = arith.mulf %375, %376 : vector<8x128xf32>
    %378 = vector.extract_strided_slice %101 {offsets = [1, 0, 0], sizes = [1, 8, 128], strides = [1, 1, 1]} : vector<4x8x128xf32> to vector<1x8x128xf32>
    %379 = vector.shape_cast %378 : vector<1x8x128xf32> to vector<8x128xf32>
    %380 = vector.broadcast %31 : f32 to vector<8x128xf32>
    %381 = arith.mulf %379, %380 : vector<8x128xf32>
    %382 = arith.addf %377, %381 : vector<8x128xf32>
    %383 = vector.extract_strided_slice %101 {offsets = [2, 0, 0], sizes = [1, 8, 128], strides = [1, 1, 1]} : vector<4x8x128xf32> to vector<1x8x128xf32>
    %384 = vector.shape_cast %383 : vector<1x8x128xf32> to vector<8x128xf32>
    %385 = vector.broadcast %51 : f32 to vector<8x128xf32>
    %386 = arith.mulf %384, %385 : vector<8x128xf32>
    %387 = arith.addf %382, %386 : vector<8x128xf32>
    %388 = vector.extract_strided_slice %101 {offsets = [3, 0, 0], sizes = [1, 8, 128], strides = [1, 1, 1]} : vector<4x8x128xf32> to vector<1x8x128xf32>
    %389 = vector.shape_cast %388 : vector<1x8x128xf32> to vector<8x128xf32>
    %390 = vector.broadcast %71 : f32 to vector<8x128xf32>
    %391 = arith.mulf %389, %390 : vector<8x128xf32>
    %392 = arith.addf %387, %391 : vector<8x128xf32>
    %393 = vector.broadcast %91 : f32 to vector<8x128xf32>
    %394 = arith.addf %392, %393 : vector<8x128xf32>
    %395 = arith.cmpf ogt, %394, %371 : vector<8x128xf32>
    %396 = arith.select %395, %394, %371 : vector<8x128xi1>, vector<8x128xf32>
    %c11_i32 = arith.constant 11 : i32
    %397 = vector.broadcast %c11_i32 : i32 to vector<8x128xi32>
    %398 = arith.select %395, %397, %373 : vector<8x128xi1>, vector<8x128xi32>
    %399 = vector.extract_strided_slice %101 {offsets = [0, 0, 0], sizes = [1, 8, 128], strides = [1, 1, 1]} : vector<4x8x128xf32> to vector<1x8x128xf32>
    %400 = vector.shape_cast %399 : vector<1x8x128xf32> to vector<8x128xf32>
    %401 = vector.broadcast %12 : f32 to vector<8x128xf32>
    %402 = arith.mulf %400, %401 : vector<8x128xf32>
    %403 = vector.extract_strided_slice %101 {offsets = [1, 0, 0], sizes = [1, 8, 128], strides = [1, 1, 1]} : vector<4x8x128xf32> to vector<1x8x128xf32>
    %404 = vector.shape_cast %403 : vector<1x8x128xf32> to vector<8x128xf32>
    %405 = vector.broadcast %32 : f32 to vector<8x128xf32>
    %406 = arith.mulf %404, %405 : vector<8x128xf32>
    %407 = arith.addf %402, %406 : vector<8x128xf32>
    %408 = vector.extract_strided_slice %101 {offsets = [2, 0, 0], sizes = [1, 8, 128], strides = [1, 1, 1]} : vector<4x8x128xf32> to vector<1x8x128xf32>
    %409 = vector.shape_cast %408 : vector<1x8x128xf32> to vector<8x128xf32>
    %410 = vector.broadcast %52 : f32 to vector<8x128xf32>
    %411 = arith.mulf %409, %410 : vector<8x128xf32>
    %412 = arith.addf %407, %411 : vector<8x128xf32>
    %413 = vector.extract_strided_slice %101 {offsets = [3, 0, 0], sizes = [1, 8, 128], strides = [1, 1, 1]} : vector<4x8x128xf32> to vector<1x8x128xf32>
    %414 = vector.shape_cast %413 : vector<1x8x128xf32> to vector<8x128xf32>
    %415 = vector.broadcast %72 : f32 to vector<8x128xf32>
    %416 = arith.mulf %414, %415 : vector<8x128xf32>
    %417 = arith.addf %412, %416 : vector<8x128xf32>
    %418 = vector.broadcast %92 : f32 to vector<8x128xf32>
    %419 = arith.addf %417, %418 : vector<8x128xf32>
    %420 = arith.cmpf ogt, %419, %396 : vector<8x128xf32>
    %421 = arith.select %420, %419, %396 : vector<8x128xi1>, vector<8x128xf32>
    %c12_i32 = arith.constant 12 : i32
    %422 = vector.broadcast %c12_i32 : i32 to vector<8x128xi32>
    %423 = arith.select %420, %422, %398 : vector<8x128xi1>, vector<8x128xi32>
    %424 = vector.extract_strided_slice %101 {offsets = [0, 0, 0], sizes = [1, 8, 128], strides = [1, 1, 1]} : vector<4x8x128xf32> to vector<1x8x128xf32>
    %425 = vector.shape_cast %424 : vector<1x8x128xf32> to vector<8x128xf32>
    %426 = vector.broadcast %13 : f32 to vector<8x128xf32>
    %427 = arith.mulf %425, %426 : vector<8x128xf32>
    %428 = vector.extract_strided_slice %101 {offsets = [1, 0, 0], sizes = [1, 8, 128], strides = [1, 1, 1]} : vector<4x8x128xf32> to vector<1x8x128xf32>
    %429 = vector.shape_cast %428 : vector<1x8x128xf32> to vector<8x128xf32>
    %430 = vector.broadcast %33 : f32 to vector<8x128xf32>
    %431 = arith.mulf %429, %430 : vector<8x128xf32>
    %432 = arith.addf %427, %431 : vector<8x128xf32>
    %433 = vector.extract_strided_slice %101 {offsets = [2, 0, 0], sizes = [1, 8, 128], strides = [1, 1, 1]} : vector<4x8x128xf32> to vector<1x8x128xf32>
    %434 = vector.shape_cast %433 : vector<1x8x128xf32> to vector<8x128xf32>
    %435 = vector.broadcast %53 : f32 to vector<8x128xf32>
    %436 = arith.mulf %434, %435 : vector<8x128xf32>
    %437 = arith.addf %432, %436 : vector<8x128xf32>
    %438 = vector.extract_strided_slice %101 {offsets = [3, 0, 0], sizes = [1, 8, 128], strides = [1, 1, 1]} : vector<4x8x128xf32> to vector<1x8x128xf32>
    %439 = vector.shape_cast %438 : vector<1x8x128xf32> to vector<8x128xf32>
    %440 = vector.broadcast %73 : f32 to vector<8x128xf32>
    %441 = arith.mulf %439, %440 : vector<8x128xf32>
    %442 = arith.addf %437, %441 : vector<8x128xf32>
    %443 = vector.broadcast %93 : f32 to vector<8x128xf32>
    %444 = arith.addf %442, %443 : vector<8x128xf32>
    %445 = arith.cmpf ogt, %444, %421 : vector<8x128xf32>
    %446 = arith.select %445, %444, %421 : vector<8x128xi1>, vector<8x128xf32>
    %c13_i32 = arith.constant 13 : i32
    %447 = vector.broadcast %c13_i32 : i32 to vector<8x128xi32>
    %448 = arith.select %445, %447, %423 : vector<8x128xi1>, vector<8x128xi32>
    %449 = vector.extract_strided_slice %101 {offsets = [0, 0, 0], sizes = [1, 8, 128], strides = [1, 1, 1]} : vector<4x8x128xf32> to vector<1x8x128xf32>
    %450 = vector.shape_cast %449 : vector<1x8x128xf32> to vector<8x128xf32>
    %451 = vector.broadcast %14 : f32 to vector<8x128xf32>
    %452 = arith.mulf %450, %451 : vector<8x128xf32>
    %453 = vector.extract_strided_slice %101 {offsets = [1, 0, 0], sizes = [1, 8, 128], strides = [1, 1, 1]} : vector<4x8x128xf32> to vector<1x8x128xf32>
    %454 = vector.shape_cast %453 : vector<1x8x128xf32> to vector<8x128xf32>
    %455 = vector.broadcast %34 : f32 to vector<8x128xf32>
    %456 = arith.mulf %454, %455 : vector<8x128xf32>
    %457 = arith.addf %452, %456 : vector<8x128xf32>
    %458 = vector.extract_strided_slice %101 {offsets = [2, 0, 0], sizes = [1, 8, 128], strides = [1, 1, 1]} : vector<4x8x128xf32> to vector<1x8x128xf32>
    %459 = vector.shape_cast %458 : vector<1x8x128xf32> to vector<8x128xf32>
    %460 = vector.broadcast %54 : f32 to vector<8x128xf32>
    %461 = arith.mulf %459, %460 : vector<8x128xf32>
    %462 = arith.addf %457, %461 : vector<8x128xf32>
    %463 = vector.extract_strided_slice %101 {offsets = [3, 0, 0], sizes = [1, 8, 128], strides = [1, 1, 1]} : vector<4x8x128xf32> to vector<1x8x128xf32>
    %464 = vector.shape_cast %463 : vector<1x8x128xf32> to vector<8x128xf32>
    %465 = vector.broadcast %74 : f32 to vector<8x128xf32>
    %466 = arith.mulf %464, %465 : vector<8x128xf32>
    %467 = arith.addf %462, %466 : vector<8x128xf32>
    %468 = vector.broadcast %94 : f32 to vector<8x128xf32>
    %469 = arith.addf %467, %468 : vector<8x128xf32>
    %470 = arith.cmpf ogt, %469, %446 : vector<8x128xf32>
    %471 = arith.select %470, %469, %446 : vector<8x128xi1>, vector<8x128xf32>
    %c14_i32 = arith.constant 14 : i32
    %472 = vector.broadcast %c14_i32 : i32 to vector<8x128xi32>
    %473 = arith.select %470, %472, %448 : vector<8x128xi1>, vector<8x128xi32>
    %474 = vector.extract_strided_slice %101 {offsets = [0, 0, 0], sizes = [1, 8, 128], strides = [1, 1, 1]} : vector<4x8x128xf32> to vector<1x8x128xf32>
    %475 = vector.shape_cast %474 : vector<1x8x128xf32> to vector<8x128xf32>
    %476 = vector.broadcast %15 : f32 to vector<8x128xf32>
    %477 = arith.mulf %475, %476 : vector<8x128xf32>
    %478 = vector.extract_strided_slice %101 {offsets = [1, 0, 0], sizes = [1, 8, 128], strides = [1, 1, 1]} : vector<4x8x128xf32> to vector<1x8x128xf32>
    %479 = vector.shape_cast %478 : vector<1x8x128xf32> to vector<8x128xf32>
    %480 = vector.broadcast %35 : f32 to vector<8x128xf32>
    %481 = arith.mulf %479, %480 : vector<8x128xf32>
    %482 = arith.addf %477, %481 : vector<8x128xf32>
    %483 = vector.extract_strided_slice %101 {offsets = [2, 0, 0], sizes = [1, 8, 128], strides = [1, 1, 1]} : vector<4x8x128xf32> to vector<1x8x128xf32>
    %484 = vector.shape_cast %483 : vector<1x8x128xf32> to vector<8x128xf32>
    %485 = vector.broadcast %55 : f32 to vector<8x128xf32>
    %486 = arith.mulf %484, %485 : vector<8x128xf32>
    %487 = arith.addf %482, %486 : vector<8x128xf32>
    %488 = vector.extract_strided_slice %101 {offsets = [3, 0, 0], sizes = [1, 8, 128], strides = [1, 1, 1]} : vector<4x8x128xf32> to vector<1x8x128xf32>
    %489 = vector.shape_cast %488 : vector<1x8x128xf32> to vector<8x128xf32>
    %490 = vector.broadcast %75 : f32 to vector<8x128xf32>
    %491 = arith.mulf %489, %490 : vector<8x128xf32>
    %492 = arith.addf %487, %491 : vector<8x128xf32>
    %493 = vector.broadcast %95 : f32 to vector<8x128xf32>
    %494 = arith.addf %492, %493 : vector<8x128xf32>
    %495 = arith.cmpf ogt, %494, %471 : vector<8x128xf32>
    %496 = arith.select %495, %494, %471 : vector<8x128xi1>, vector<8x128xf32>
    %c15_i32 = arith.constant 15 : i32
    %497 = vector.broadcast %c15_i32 : i32 to vector<8x128xi32>
    %498 = arith.select %495, %497, %473 : vector<8x128xi1>, vector<8x128xi32>
    %499 = vector.extract_strided_slice %101 {offsets = [0, 0, 0], sizes = [1, 8, 128], strides = [1, 1, 1]} : vector<4x8x128xf32> to vector<1x8x128xf32>
    %500 = vector.shape_cast %499 : vector<1x8x128xf32> to vector<8x128xf32>
    %501 = vector.broadcast %16 : f32 to vector<8x128xf32>
    %502 = arith.mulf %500, %501 : vector<8x128xf32>
    %503 = vector.extract_strided_slice %101 {offsets = [1, 0, 0], sizes = [1, 8, 128], strides = [1, 1, 1]} : vector<4x8x128xf32> to vector<1x8x128xf32>
    %504 = vector.shape_cast %503 : vector<1x8x128xf32> to vector<8x128xf32>
    %505 = vector.broadcast %36 : f32 to vector<8x128xf32>
    %506 = arith.mulf %504, %505 : vector<8x128xf32>
    %507 = arith.addf %502, %506 : vector<8x128xf32>
    %508 = vector.extract_strided_slice %101 {offsets = [2, 0, 0], sizes = [1, 8, 128], strides = [1, 1, 1]} : vector<4x8x128xf32> to vector<1x8x128xf32>
    %509 = vector.shape_cast %508 : vector<1x8x128xf32> to vector<8x128xf32>
    %510 = vector.broadcast %56 : f32 to vector<8x128xf32>
    %511 = arith.mulf %509, %510 : vector<8x128xf32>
    %512 = arith.addf %507, %511 : vector<8x128xf32>
    %513 = vector.extract_strided_slice %101 {offsets = [3, 0, 0], sizes = [1, 8, 128], strides = [1, 1, 1]} : vector<4x8x128xf32> to vector<1x8x128xf32>
    %514 = vector.shape_cast %513 : vector<1x8x128xf32> to vector<8x128xf32>
    %515 = vector.broadcast %76 : f32 to vector<8x128xf32>
    %516 = arith.mulf %514, %515 : vector<8x128xf32>
    %517 = arith.addf %512, %516 : vector<8x128xf32>
    %518 = vector.broadcast %96 : f32 to vector<8x128xf32>
    %519 = arith.addf %517, %518 : vector<8x128xf32>
    %520 = arith.cmpf ogt, %519, %496 : vector<8x128xf32>
    %521 = arith.select %520, %519, %496 : vector<8x128xi1>, vector<8x128xf32>
    %c16_i32 = arith.constant 16 : i32
    %522 = vector.broadcast %c16_i32 : i32 to vector<8x128xi32>
    %523 = arith.select %520, %522, %498 : vector<8x128xi1>, vector<8x128xi32>
    %524 = vector.extract_strided_slice %101 {offsets = [0, 0, 0], sizes = [1, 8, 128], strides = [1, 1, 1]} : vector<4x8x128xf32> to vector<1x8x128xf32>
    %525 = vector.shape_cast %524 : vector<1x8x128xf32> to vector<8x128xf32>
    %526 = vector.broadcast %17 : f32 to vector<8x128xf32>
    %527 = arith.mulf %525, %526 : vector<8x128xf32>
    %528 = vector.extract_strided_slice %101 {offsets = [1, 0, 0], sizes = [1, 8, 128], strides = [1, 1, 1]} : vector<4x8x128xf32> to vector<1x8x128xf32>
    %529 = vector.shape_cast %528 : vector<1x8x128xf32> to vector<8x128xf32>
    %530 = vector.broadcast %37 : f32 to vector<8x128xf32>
    %531 = arith.mulf %529, %530 : vector<8x128xf32>
    %532 = arith.addf %527, %531 : vector<8x128xf32>
    %533 = vector.extract_strided_slice %101 {offsets = [2, 0, 0], sizes = [1, 8, 128], strides = [1, 1, 1]} : vector<4x8x128xf32> to vector<1x8x128xf32>
    %534 = vector.shape_cast %533 : vector<1x8x128xf32> to vector<8x128xf32>
    %535 = vector.broadcast %57 : f32 to vector<8x128xf32>
    %536 = arith.mulf %534, %535 : vector<8x128xf32>
    %537 = arith.addf %532, %536 : vector<8x128xf32>
    %538 = vector.extract_strided_slice %101 {offsets = [3, 0, 0], sizes = [1, 8, 128], strides = [1, 1, 1]} : vector<4x8x128xf32> to vector<1x8x128xf32>
    %539 = vector.shape_cast %538 : vector<1x8x128xf32> to vector<8x128xf32>
    %540 = vector.broadcast %77 : f32 to vector<8x128xf32>
    %541 = arith.mulf %539, %540 : vector<8x128xf32>
    %542 = arith.addf %537, %541 : vector<8x128xf32>
    %543 = vector.broadcast %97 : f32 to vector<8x128xf32>
    %544 = arith.addf %542, %543 : vector<8x128xf32>
    %545 = arith.cmpf ogt, %544, %521 : vector<8x128xf32>
    %546 = arith.select %545, %544, %521 : vector<8x128xi1>, vector<8x128xf32>
    %c17_i32 = arith.constant 17 : i32
    %547 = vector.broadcast %c17_i32 : i32 to vector<8x128xi32>
    %548 = arith.select %545, %547, %523 : vector<8x128xi1>, vector<8x128xi32>
    %549 = vector.extract_strided_slice %101 {offsets = [0, 0, 0], sizes = [1, 8, 128], strides = [1, 1, 1]} : vector<4x8x128xf32> to vector<1x8x128xf32>
    %550 = vector.shape_cast %549 : vector<1x8x128xf32> to vector<8x128xf32>
    %551 = vector.broadcast %18 : f32 to vector<8x128xf32>
    %552 = arith.mulf %550, %551 : vector<8x128xf32>
    %553 = vector.extract_strided_slice %101 {offsets = [1, 0, 0], sizes = [1, 8, 128], strides = [1, 1, 1]} : vector<4x8x128xf32> to vector<1x8x128xf32>
    %554 = vector.shape_cast %553 : vector<1x8x128xf32> to vector<8x128xf32>
    %555 = vector.broadcast %38 : f32 to vector<8x128xf32>
    %556 = arith.mulf %554, %555 : vector<8x128xf32>
    %557 = arith.addf %552, %556 : vector<8x128xf32>
    %558 = vector.extract_strided_slice %101 {offsets = [2, 0, 0], sizes = [1, 8, 128], strides = [1, 1, 1]} : vector<4x8x128xf32> to vector<1x8x128xf32>
    %559 = vector.shape_cast %558 : vector<1x8x128xf32> to vector<8x128xf32>
    %560 = vector.broadcast %58 : f32 to vector<8x128xf32>
    %561 = arith.mulf %559, %560 : vector<8x128xf32>
    %562 = arith.addf %557, %561 : vector<8x128xf32>
    %563 = vector.extract_strided_slice %101 {offsets = [3, 0, 0], sizes = [1, 8, 128], strides = [1, 1, 1]} : vector<4x8x128xf32> to vector<1x8x128xf32>
    %564 = vector.shape_cast %563 : vector<1x8x128xf32> to vector<8x128xf32>
    %565 = vector.broadcast %78 : f32 to vector<8x128xf32>
    %566 = arith.mulf %564, %565 : vector<8x128xf32>
    %567 = arith.addf %562, %566 : vector<8x128xf32>
    %568 = vector.broadcast %98 : f32 to vector<8x128xf32>
    %569 = arith.addf %567, %568 : vector<8x128xf32>
    %570 = arith.cmpf ogt, %569, %546 : vector<8x128xf32>
    %571 = arith.select %570, %569, %546 : vector<8x128xi1>, vector<8x128xf32>
    %c18_i32 = arith.constant 18 : i32
    %572 = vector.broadcast %c18_i32 : i32 to vector<8x128xi32>
    %573 = arith.select %570, %572, %548 : vector<8x128xi1>, vector<8x128xi32>
    %574 = vector.extract_strided_slice %101 {offsets = [0, 0, 0], sizes = [1, 8, 128], strides = [1, 1, 1]} : vector<4x8x128xf32> to vector<1x8x128xf32>
    %575 = vector.shape_cast %574 : vector<1x8x128xf32> to vector<8x128xf32>
    %576 = vector.broadcast %19 : f32 to vector<8x128xf32>
    %577 = arith.mulf %575, %576 : vector<8x128xf32>
    %578 = vector.extract_strided_slice %101 {offsets = [1, 0, 0], sizes = [1, 8, 128], strides = [1, 1, 1]} : vector<4x8x128xf32> to vector<1x8x128xf32>
    %579 = vector.shape_cast %578 : vector<1x8x128xf32> to vector<8x128xf32>
    %580 = vector.broadcast %39 : f32 to vector<8x128xf32>
    %581 = arith.mulf %579, %580 : vector<8x128xf32>
    %582 = arith.addf %577, %581 : vector<8x128xf32>
    %583 = vector.extract_strided_slice %101 {offsets = [2, 0, 0], sizes = [1, 8, 128], strides = [1, 1, 1]} : vector<4x8x128xf32> to vector<1x8x128xf32>
    %584 = vector.shape_cast %583 : vector<1x8x128xf32> to vector<8x128xf32>
    %585 = vector.broadcast %59 : f32 to vector<8x128xf32>
    %586 = arith.mulf %584, %585 : vector<8x128xf32>
    %587 = arith.addf %582, %586 : vector<8x128xf32>
    %588 = vector.extract_strided_slice %101 {offsets = [3, 0, 0], sizes = [1, 8, 128], strides = [1, 1, 1]} : vector<4x8x128xf32> to vector<1x8x128xf32>
    %589 = vector.shape_cast %588 : vector<1x8x128xf32> to vector<8x128xf32>
    %590 = vector.broadcast %79 : f32 to vector<8x128xf32>
    %591 = arith.mulf %589, %590 : vector<8x128xf32>
    %592 = arith.addf %587, %591 : vector<8x128xf32>
    %593 = vector.broadcast %99 : f32 to vector<8x128xf32>
    %594 = arith.addf %592, %593 : vector<8x128xf32>
    %595 = arith.cmpf ogt, %594, %571 : vector<8x128xf32>
    %c19_i32 = arith.constant 19 : i32
    %596 = vector.broadcast %c19_i32 : i32 to vector<8x128xi32>
    %597 = arith.select %595, %596, %573 : vector<8x128xi1>, vector<8x128xi32>
    %c0_24 = arith.constant 0 : index
    %c0_25 = arith.constant 0 : index
    %c0_26 = arith.constant 0 : index
    %598 = vector.load %arg5[%c0_24, %c0_25, %c0_26] : memref<1x8x128xi32, #tpu.memory_space<vmem>>, vector<1x8x128xi32>
    %599 = vector.shape_cast %598 : vector<1x8x128xi32> to vector<8x128xi32>
    %600 = vector.shape_cast %597 : vector<8x128xi32> to vector<1x8x128xi32>
    tpu.vector_store %arg5[%c0_24, %c0_25, %c0_26], %600 {strides = array<i32>} : memref<1x8x128xi32, #tpu.memory_space<vmem>>, vector<1x8x128xi32>,
    return
  }
  func.func @transform_0(%arg0: i32, %arg1: i32) -> (i32, i32, i32, i32) {
    %c0_i32 = arith.constant 0 : i32
    %c0_i32_0 = arith.constant 0 : i32
    %c0_i32_1 = arith.constant 0 : i32
    return %arg0, %c0_i32, %arg1, %c0_i32_0 : i32, i32, i32, i32
  }
  func.func @transform_1(%arg0: i32, %arg1: i32) -> i32 {
    %c0_i32 = arith.constant 0 : i32
    %c0_i32_0 = arith.constant 0 : i32
    return %c0_i32 : i32
  }
  func.func @transform_2(%arg0: i32, %arg1: i32) -> i32 {
    %c0_i32 = arith.constant 0 : i32
    %c0_i32_0 = arith.constant 0 : i32
    return %c0_i32 : i32
  }
  func.func @transform_3(%arg0: i32, %arg1: i32) -> (i32, i32, i32) {
    %c0_i32 = arith.constant 0 : i32
    %c0_i32_0 = arith.constant 0 : i32
    return %arg0, %arg1, %c0_i32 : i32, i32, i32
  }
}

</mosaic_0001>

<bundles_post_ra>
// kernel: tpu_custom_call.1
= control target key start
LH: loop header
LB: loop body
LE: loop exit
PB: predicated region body
PF: predicated region fallthrough
CT: control target
= control target key end

     0   :  { %s1820_s0 = inlined_call_operand.hbm [shape: f32[2,4,8,128], index: 0, kind: input, shape index: {}]   ;;  %s1821_s1 = inlined_call_operand.vmem [shape: f32[80], index: 1, kind: input, shape index: {}]   ;;  %s1822_s2 = inlined_call_operand.vmem [shape: f32[20], index: 2, kind: input, shape index: {}]   ;;  %s1823_s3 = inlined_call_operand.hbm [shape: s32[2,8,128], index: 3, kind: output, shape index: {}]  }
   0x1   :  { %1830 = sst [smem:[#allocation14_spill]] %s1820_s0 }
   0x2   :  { %1831 = sst [smem:[#allocation15_spill]] %s1821_s1 }
   0x3   :  { %1832 = sst [smem:[#allocation16_spill]] %s1822_s2 }
   0x4   :  { %8 = vsyncpa [#allocation3], 0 }
   0x5   :  { %10 = vsyncpa [#allocation3 + $0x1], 0 }
   0x6   :  { %11 = vsyncpa [#allocation5], 0 }
   0x7   :  { %12 = vsyncpa [#allocation8], 0 }
   0x8   :  { %13 = vsyncpa [#allocation4], 0 }
   0x9   :  { %15 = vsyncpa [#allocation4 + $0x1], 0  ;;  %s1154_s12 = smov 0   ;;  %s1156_s13 = smov 0  }
   0xa   :  { %s1158_s14 = smov 0   ;;  %s1160_s15 = smov 0  }
   0xb   :  { %s1162_s16 = smov 0   ;;  %s1164_s17 = smov 0  }
   0xc LB: > { %s772_s18 = sadd.s32 4294967295, %s1125_s17   ;;  %s773_s19 = sadd.s32 4294967294, %s1125_s17   ;;  %s1125_s17 = sphi %s1164_s17, %s21_s17   ;;  %s1121_s16 = sphi %s1162_s16, %s1855_s16   ;;  %s1117_s15 = sphi %s1160_s15, %s1854_s15   ;;  %s1113_s14 = sphi %s1158_s14, %s1853_s14   ;;  %s1109_s13 = sphi %s1156_s13, %s1852_s13   ;;  %s1105_s12 = sphi %s1154_s12, %s1851_s12  }
   0xd   : > { %s42_s20 = sadd.s32 1, %s1113_s14  ;;  %p49_p0 = scmp.ne.s32.totalorder %s1113_s14, %s1109_s13 }
   0xe   : > { %p50_p1 = scmp.eq.s32.totalorder %s1125_s17, 0  ;;  %p55_p2 = scmp.ne.s32.totalorder %s1109_s13, %s1105_s12 }
   0xf   : > { %p1192_p3 = scmp.eq.s32.totalorder %s772_s18, 0  ;;  %p123_p4 = scmp.eq.s32.totalorder %s772_s18, 1 }
  0x10   : > { %p1196_p5 = por %p50_p1, %p49_p0  ;;  %p129_p6 = scmp.eq.s32.totalorder %s773_s19, 1 }
  0x11   : > { %s1833_s21 = scalar_select %p1192_p3, 1, 0 }
  0x12   : > { %p1202_p7 = por %p1192_p3, %p55_p2  ;;  %p1206_p8 = por %p123_p4, %p49_p0 }
  0x13   : > { %p1210_p9 = por %p129_p6, %p55_p2  ;;  %p774_p10 = scmp.ge.s32.totalorder %s1125_s17, 1 }
  0x14   : > { %s1835_s23 = scalar_select %p1202_p7, 1, 0 }
  0x15   : > { %s1836_s24 = scalar_select %p1206_p8, 1, 0 }
  0x16   : > { %s1837_s25 = scalar_select %p1210_p9, 1, 0 }
  0x17   : > { %p136_p11 = scmp.lt.s32.totalorder %s1125_s17, 3  ;;  %s1838_s1 = sld [smem:[#allocation15_spill]] }
  0x18   : > { %p918_p0 = scmp.lt.s32.totalorder %s1125_s17, 2  ;;  %s1840_s2 = sld [smem:[#allocation16_spill]] }
  0x19   : > { %p1219_p12 = pnand %p774_p10, %p136_p11 }
  0x1a   : > { %p1232_p2 = pnand %p918_p0, %p1196_p5 }
  0x1b   : > { %s1839_s29 = scalar_select %p1219_p12, 1, 0 }
  0x1c   : > { %p901_p1 = pneg %p1219_p12 }
  0x1d   : > { %s149_s28 = sshll.u32 %s1838_s1, 4  ;;  %s150_s28 = int_to_ptr.vmem [resolvable:$true] %s149_s28 }
  0x1e   : > { %s160_s5 = sshll.u32 %s1840_s2, 4  ;;  %p1238_p4 = pnand %p901_p1, %p1192_p3  ;;  %s161_s5 = int_to_ptr.vmem [resolvable:$true] %s160_s5 }
  0x1f   : > { %s1841_s6 = scalar_select %p1232_p2, 1, 0 }
  0x20   : > { %s975_s8 = scalar_lea.vmem %s150_s28, 16  ;;  %p977_p10 = pneg %p1238_p4 }
  0x21   : > { %p976_p6 = scmp.ne.s32.totalorder %s150_s28, %s975_s8  ;;  %p983_p9 = scmp.lt.s32.totalorder %s150_s28, %s150_s28 }
  0x22   : > { %p984_p8 = scmp.lt.s32.totalorder %s975_s8, %s975_s8 }
  0x23   : > { %p978_p11 = pnand %p977_p10, %p976_p6 }
  0x24   : > { %p985_p7 = por %p984_p8, %p983_p9 }
  0x25   : > { %p979_p13 = pneg %p978_p11 }
  0x27   : > { %p986_p5 = pnand %p985_p7, %p979_p13 }
  0x29   : > { %989 = shalt.err (!%p986_p5)
}
  0x2a   : > { %s1127_s9 = smov [#allocation6]   ;;  %s990_s10 = scalar_lea.vmem %s161_s5, 16 }
  0x2b   : > { %904 = dma.vmem_to_smem (!%p1238_p4), %s150_s28, 16, %s1127_s9, [#allocation5]  }
  0x2c   : > { %p991_p0 = scmp.ne.s32.totalorder %s161_s5, %s990_s10  ;;  %p998_p12 = scmp.lt.s32.totalorder %s161_s5, %s161_s5 }
  0x2d   : > { %p999_p2 = scmp.lt.s32.totalorder %s990_s10, %s990_s10 }
  0x2e   : > { %p993_p1 = pnand %p991_p0, %p977_p10 }
  0x2f   : > { %p1000_p6 = por %p999_p2, %p998_p12 }
  0x30   : > { %p994_p3 = pneg %p993_p1 }
  0x32   : > { %p1001_p11 = pnand %p1000_p6, %p994_p3 }
  0x34   : > { %1004 = shalt.err (!%p1001_p11)
}
  0x35   : > { %s1128_s11 = smov [#allocation7]   ;;  %s33_s18 = sadd.s32 1, %s1121_s16 }
  0x36   : > { %907 = dma.vmem_to_smem (!%p1238_p4), %s161_s5, 16, %s1128_s11, [#allocation8]  }
  0x37   : > { %s171_s19 = sand.u32 1, %s1113_s14   ;;  %p35_p7 = scmp.ge.s32.totalorder %s33_s18, 2 }
  0x38   : > { %s778_s22 = sshll.u32 %s171_s19, 5  ;;  %s888_s26 = sshll.u32 %s1121_s16, 9 }
  0x39   : > { %s1857_s18 = smov (%p35_p7, %s33_s18), 0  ;;  %s1843_s0 = sld [smem:[#allocation14_spill]] }
  0x3a   : > { %s37_s4 = ssub.s32 %s1121_s16, %s1857_s18  ;;  %s175_s5 = scalar_lea.vmem [#allocation2], %s778_s22 }
  0x3b   : > { %s183_s7 = sshll.u32 %s175_s5, 4  ;;  %p40_p3 = scmp.eq.s32.totalorder %s37_s4, 0  ;;  %s1260_s7 = int_to_ptr.vmem [resolvable:$true] %s183_s7 }
  0x3c   : > { %s1267_s9 = scalar_lea.sflag [#allocation3], %s171_s19  ;;  %p1844_p9 = scmp.ne.s32.totalorder %s1841_s6, 0 }
  0x3d   : > { %s1265_s8 = scalar_select %p40_p3, %s1113_s14, %s42_s20  }
  0x3e   : > { %p1007_p12 = pneg %p1844_p9 }
  0x3f   : > { %s1256_s30 = scalar_lea.hbm %s1843_s0, %s888_s26  ;;  %s1010_s22 = scalar_lea.hbm %s1843_s0, 1024 }
  0x40   : > { %s1005_s10 = scalar_lea.hbm %s1256_s30, 512  ;;  %p1011_p4 = scmp.lt.u32.totalorder %s1256_s30, %s1843_s0 }
  0x41   : > { %p1006_p8 = scmp.ne.s32.totalorder %s1256_s30, %s1005_s10  ;;  %p1012_p10 = scmp.lt.u32.totalorder %s1010_s22, %s1005_s10 }
  0x42   : > { %p1014_p0 = scmp.lt.u32.totalorder %s1005_s10, %s1256_s30 }
  0x43   : > { %p1008_p13 = pnand %p1007_p12, %p1006_p8  ;;  %p1013_p5 = por %p1012_p10, %p1011_p4 }
  0x45   : > { %p1009_p2 = pneg %p1008_p13  ;;  %p1015_p1 = por %p1014_p0, %p1013_p5 }
  0x47   : > { %p1016_p6 = pnand %p1015_p1, %p1009_p2 }
  0x49   : > { %1019 = shalt.err (!%p1016_p6)
}
  0x4a   : > { %s1020_s20 = scalar_lea.vmem %s1260_s7, 512  ;;  %s1129_s19 = smov [#allocation2]  }
  0x4b   : > { %p1021_p11 = scmp.ne.s32.totalorder %s1260_s7, %s1020_s20  ;;  %s1025_s4 = sshll.u32 %s1129_s19, 4  ;;  %s1026_s4 = int_to_ptr.vmem [resolvable:$false] %s1025_s4 }
  0x4c   : > { %s1027_s5 = scalar_lea.vmem %s1026_s4, 1024  ;;  %p1028_p8 = scmp.lt.s32.totalorder %s1260_s7, %s1026_s4 }
  0x4d   : > { %p1023_p7 = pnand %p1021_p11, %p1007_p12  ;;  %p1029_p13 = scmp.lt.s32.totalorder %s1027_s5, %s1020_s20 }
  0x4f   : > { %p1024_p3 = pneg %p1023_p7  ;;  %p1030_p4 = por %p1029_p13, %p1028_p8 }
  0x51   : > { %p1031_p10 = pnand %p1030_p4, %p1024_p3 }
  0x53   : > { %1034 = shalt.err (!%p1031_p10)
}
  0x54   : > { %s1130_s10 = smov 128   ;;  %s1131_s11 = smov 8  }
  0x55   : > { %911 = dma.hbm_to_vmem [thread:$0]  (!%p1844_p9), %s1256_s30, 512, %s1260_s7, %s1267_s9, %s1130_s10, %s1130_s10, %s1131_s11  }
  0x56   : > { %p1845_p12 = scmp.ne.s32.totalorder %s1839_s29, 0 }
  0x57   : > { %s1298_s26 = sand.u32 (!%p1845_p12), 1, %s1109_s13   ;;  %p1846_p2 = scmp.ne.s32.totalorder (!%p1845_p12), %s1835_s23, 0 }
  0x58   : > { %195 = sbr.rel (%p1845_p12) target bundleno = 209 (0xd1), region = 32  ;;  %s782_s22 = sshll.u32 (!%p1845_p12), %s1298_s26, 5 }
  0x59   : > { %s198_s27 = scalar_lea.sflag (!%p1845_p12), [#allocation3], %s1298_s26  ;;  %s1302_s28 = scalar_lea.vmem (!%p1845_p12), [#allocation2], %s782_s22 }
  0x5f   : > { %1088 = dma.done.wait (%p1846_p2), %s198_s27, 512  }
  0x60   : > { %1090 = vsyncadd (%p1846_p2), %s198_s27, 4294966784  ;;  %p1847_p9 = scmp.ne.s32.totalorder %s1833_s21, 0 }
  0x62   : > { %1092 = dma.done.wait (%p1847_p9), [#allocation5], 16  }
  0x63   : > { %1094 = vsyncadd (%p1847_p9), [#allocation5], 4294967280 }
  0x64   : > { %1096 = dma.done.wait (%p1847_p9), [#allocation8], 16  }
  0x65   : > { %1098 = vsyncadd (%p1847_p9), [#allocation8], 4294967280 }
  0x66   : > { %214 = sfence }
  0x67   : > { %s233_s29 = sld [smem:[#allocation6]]  ;;  %s786_s6 = sld [smem:[#allocation6 + $0x1]]  ;;  %v1327_v0 = vld [vmem:[%s1302_s28] sm:$0xff]  ;;  %v1414_v30 = vld [vmem:[%s1302_s28 + $0x8] sm:$0xff] }
  0x68   : > { %s787_s30 = sld [smem:[#allocation6 + $0x2]]  ;;  %s788_s7 = sld [smem:[#allocation6 + $0x3]] }
  0x69   : > { %s789_s23 = sld [smem:[#allocation6 + $0x4]]  ;;  %s1316_s9 = sld [smem:[#allocation6 + $0x5]] }
  0x6a   : > { %s1318_s20 = sld [smem:[#allocation6 + $0x6]]  ;;  %s1320_s19 = sld [smem:[#allocation6 + $0x7]] }
  0x6b   : > { %s1322_s4 = sld [smem:[#allocation6 + $0x8]]  ;;  %s1324_s5 = sld [smem:[#allocation6 + $0x9]] }
  0x6c   : > { %s1329_s21 = sld [smem:[#allocation6 + $0xa]]  ;;  %s1331_s10 = sld [smem:[#allocation6 + $0xb]] }
  0x6d   : > { %v337_v1 = vstv %s233_s29  ;;  %s1333_s11 = sld [smem:[#allocation6 + $0xc]]  ;;  %s1335_s22 = sld [smem:[#allocation6 + $0xd]]  ;;  %v350_v2 = vstv %s786_s6 }
  0x6e   : > { %s1337_s27 = sld [smem:[#allocation6 + $0xe]]  ;;  %s1339_s0 = sld [smem:[#allocation6 + $0xf]]  ;;  %v1342_v3 = vmul.f32 %v337_v1, %v1327_v0  ;;  %v366_v4 = vstv %s787_s30  ;;  %v382_v5 = vstv %s788_s7  ;;  %v351_v6 = vmul.f32 %v350_v2, %v1327_v0 }
  0x6f   : > { %s1344_s1 = sld [smem:[#allocation6 + $0x10]]  ;;  %s1346_s29 = sld [smem:[#allocation6 + $0x11]]  ;;  %v1350_v7 = vmul.f32 %v366_v4, %v1327_v0  ;;  %v398_v8 = vstv %s789_s23  ;;  %v414_v9 = vstv %s1316_s9  ;;  %v383_v10 = vmul.f32 %v382_v5, %v1327_v0 }
  0x70   : > { %s1353_s6 = sld [smem:[#allocation6 + $0x12]]  ;;  %s1355_s2 = sld [smem:[#allocation6 + $0x13]]  ;;  %v1359_v11 = vmul.f32 %v398_v8, %v1327_v0  ;;  %v430_v12 = vstv %s1318_s20  ;;  %v446_v13 = vstv %s1320_s19  ;;  %v415_v14 = vmul.f32 %v414_v9, %v1327_v0  ;;  %v1494_v8 = vld [vmem:[%s1302_s28 + $0x10] sm:$0xff] }
  0x71   : > { %s1363_s30 = sld [smem:[#allocation6 + $0x14]]  ;;  %s1365_s7 = sld [smem:[#allocation6 + $0x15]]  ;;  %v1369_v15 = vmul.f32 %v430_v12, %v1327_v0  ;;  %v462_v16 = vstv %s1322_s4  ;;  %v478_v17 = vstv %s1324_s5  ;;  %v1378_v18 = vmul.f32 %v446_v13, %v1327_v0 }
  0x72   : > { %s1373_s23 = sld [smem:[#allocation6 + $0x16]]  ;;  %s1375_s9 = sld [smem:[#allocation6 + $0x17]]  ;;  %v1381_v19 = vmul.f32 %v462_v16, %v1327_v0  ;;  %v494_v20 = vstv %s1329_s21  ;;  %v510_v21 = vstv %s1331_s10  ;;  %v1390_v22 = vmul.f32 %v478_v17, %v1327_v0 }
  0x73   : > { %s1385_s20 = sld [smem:[#allocation6 + $0x18]]  ;;  %s1387_s19 = sld [smem:[#allocation6 + $0x19]]  ;;  %v1393_v23 = vmul.f32 %v494_v20, %v1327_v0  ;;  %v526_v24 = vstv %s1333_s11  ;;  %v542_v25 = vstv %s1335_s22  ;;  %v1402_v26 = vmul.f32 %v510_v21, %v1327_v0 }
  0x74   : > { %s1397_s4 = sld [smem:[#allocation6 + $0x1a]]  ;;  %s1399_s5 = sld [smem:[#allocation6 + $0x1b]]  ;;  %v1405_v27 = vmul.f32 %v526_v24, %v1327_v0  ;;  %v558_v28 = vstv %s1337_s27  ;;  %v574_v29 = vstv %s1339_s0  ;;  %v1417_v31 = vmul.f32 %v542_v25, %v1327_v0 }
  0x75   : > { %s1409_s21 = sld [smem:[#allocation6 + $0x1c]]  ;;  %s1411_s10 = sld [smem:[#allocation6 + $0x1d]]  ;;  %v1420_v32 = vmul.f32 %v558_v28, %v1327_v0  ;;  %v590_v33 = vstv %s1344_s1  ;;  %v606_v34 = vstv %s1346_s29  ;;  %v1429_v35 = vmul.f32 %v574_v29, %v1327_v0 }
  0x76   : > { %s1424_s0 = sld [smem:[#allocation6 + $0x1e]]  ;;  %s1426_s11 = sld [smem:[#allocation6 + $0x1f]]  ;;  %v1432_v36 = vmul.f32 %v590_v33, %v1327_v0  ;;  %v1435_v37 = vmul.f32 %v606_v34, %v1327_v0  ;;  %v622_v38 = vstv %s1353_s6  ;;  %v638_v42 = vstv %s1355_s2 }
  0x77   : > { %s1438_s1 = sld [smem:[#allocation6 + $0x20]]  ;;  %s1440_s22 = sld [smem:[#allocation6 + $0x21]]  ;;  %v339_v39 = vstv %s1363_s30  ;;  %v352_v40 = vstv %s1365_s7  ;;  %v1445_v41 = vmul.f32 %v622_v38, %v1327_v0 }
  0x78   : > { %v340_v43 = vmul.f32 %v339_v39, %v1414_v30  ;;  %v353_v44 = vmul.f32 %v352_v40, %v1414_v30  ;;  %v368_v45 = vstv %s1373_s23  ;;  %v384_v46 = vstv %s1375_s9  ;;  %s1459_s27 = sld [smem:[#allocation6 + $0x28]]  ;;  %s1461_s29 = sld [smem:[#allocation6 + $0x29]] }
  0x79   : > { %v369_v47 = vmul.f32 %v368_v45, %v1414_v30  ;;  %v385_v48 = vmul.f32 %v384_v46, %v1414_v30  ;;  %v400_v49 = vstv %s1385_s20  ;;  %v416_v50 = vstv %s1387_s19  ;;  %s1466_s6 = sld [smem:[#allocation6 + $0x2a]]  ;;  %s1468_s30 = sld [smem:[#allocation6 + $0x2b]] }
  0x7a   : > { %v341_v51 = vadd.f32 %v340_v43, %v1342_v3  ;;  %v354_v52 = vadd.f32 %v353_v44, %v351_v6  ;;  %v401_v53 = vmul.f32 %v400_v49, %v1414_v30  ;;  %v417_v54 = vmul.f32 %v416_v50, %v1414_v30  ;;  %s1473_s7 = sld [smem:[#allocation6 + $0x2c]]  ;;  %s1475_s23 = sld [smem:[#allocation6 + $0x2d]] }
  0x7b   : > { %v370_v55 = vadd.f32 %v369_v47, %v1350_v7  ;;  %v386_v56 = vadd.f32 %v385_v48, %v383_v10  ;;  %v432_v57 = vstv %s1397_s4  ;;  %v448_v58 = vstv %s1399_s5  ;;  %s1481_s9 = sld [smem:[#allocation6 + $0x2e]]  ;;  %s1483_s20 = sld [smem:[#allocation6 + $0x2f]] }
  0x7c   : > { %v402_v59 = vadd.f32 %v401_v53, %v1359_v11  ;;  %v418_v60 = vadd.f32 %v417_v54, %v415_v14  ;;  %v433_v61 = vmul.f32 %v432_v57, %v1414_v30  ;;  %v449_v62 = vmul.f32 %v448_v58, %v1414_v30  ;;  %s1489_s19 = sld [smem:[#allocation6 + $0x30]]  ;;  %s1491_s4 = sld [smem:[#allocation6 + $0x31]]  ;;  %v1555_v58 = vld [vmem:[%s1302_s28 + $0x18] sm:$0xff] }
  0x7d   : > { %v464_v63 = vstv %s1409_s21  ;;  %v480_v1 = vstv %s1411_s10  ;;  %v496_v2 = vstv %s1424_s0  ;;  %v512_v3 = vstv %s1426_s11  ;;  %s1500_s5 = sld [smem:[#allocation6 + $0x32]]  ;;  %s1502_s21 = sld [smem:[#allocation6 + $0x33]] }
  0x7e   : > { %v434_v4 = vadd.f32 %v433_v61, %v1369_v15  ;;  %v450_v5 = vadd.f32 %v449_v62, %v1378_v18  ;;  %v465_v6 = vmul.f32 %v464_v63, %v1414_v30  ;;  %v481_v7 = vmul.f32 %v480_v1, %v1414_v30  ;;  %s1508_s10 = sld [smem:[#allocation6 + $0x34]]  ;;  %s1526_s11 = sld [smem:[#allocation6 + $0x3d]] }
  0x7f   : > { %v497_v9 = vmul.f32 %v496_v2, %v1414_v30  ;;  %v513_v10 = vmul.f32 %v512_v3, %v1414_v30  ;;  %v528_v11 = vstv %s1438_s1  ;;  %v544_v12 = vstv %s1440_s22  ;;  %s1524_s0 = sld [smem:[#allocation6 + $0x3c]]  ;;  %s1530_s1 = sld [smem:[#allocation6 + $0x3e]] }
  0x80   : > { %v466_v13 = vadd.f32 %v465_v6, %v1381_v19  ;;  %v482_v14 = vadd.f32 %v481_v7, %v1390_v22  ;;  %v529_v15 = vmul.f32 %v528_v11, %v1414_v30  ;;  %v545_v16 = vmul.f32 %v544_v12, %v1414_v30  ;;  %s1532_s22 = sld [smem:[#allocation6 + $0x3f]]  ;;  %s1569_s28 = sld [smem:[#allocation6 + $0x48]] }
  0x81   : > { %v342_v17 = vstv %s1459_s27  ;;  %v355_v18 = vstv %s1461_s29  ;;  %v498_v20 = vadd.f32 %v497_v9, %v1393_v23  ;;  %v514_v21 = vadd.f32 %v513_v10, %v1402_v26  ;;  %s1536_s27 = sld [smem:[#allocation6 + $0x40]]  ;;  %s1538_s29 = sld [smem:[#allocation6 + $0x41]] }
  0x82   : > { %v343_v24 = vmul.f32 %v342_v17, %v1494_v8  ;;  %v356_v19 = vmul.f32 %v355_v18, %v1494_v8  ;;  %v371_v25 = vstv %s1466_s6  ;;  %v387_v22 = vstv %s1468_s30  ;;  %s1544_s6 = sld [smem:[#allocation6 + $0x42]]  ;;  %s1546_s30 = sld [smem:[#allocation6 + $0x43]] }
  0x83   : > { %v372_v28 = vmul.f32 %v371_v25, %v1494_v8  ;;  %v388_v29 = vmul.f32 %v387_v22, %v1494_v8  ;;  %v403_v33 = vstv %s1473_s7  ;;  %v419_v34 = vstv %s1475_s23  ;;  %s1550_s7 = sld [smem:[#allocation6 + $0x44]]  ;;  %s1552_s23 = sld [smem:[#allocation6 + $0x45]] }
  0x84   : > { %v344_v38 = vadd.f32 %v343_v24, %v341_v51  ;;  %v357_v39 = vadd.f32 %v356_v19, %v354_v52  ;;  %v404_v23 = vmul.f32 %v403_v33, %v1494_v8  ;;  %v420_v26 = vmul.f32 %v419_v34, %v1494_v8  ;;  %s885_s2 = sshll.u32 %s1117_s15, 7  ;;  %p1848_p0 = scmp.ne.s32.totalorder %s1836_s24, 0 }
  0x85   : > { %v373_v40 = vadd.f32 %v372_v28, %v370_v55  ;;  %v389_v43 = vadd.f32 %v388_v29, %v386_v56  ;;  %v435_v44 = vstv %s1481_s9  ;;  %v451_v45 = vstv %s1483_s20  ;;  %s1561_s9 = sld [smem:[#allocation6 + $0x46]]  ;;  %s1563_s20 = sld [smem:[#allocation6 + $0x47]] }
  0x86   : > { %v405_v46 = vadd.f32 %v404_v23, %v402_v59  ;;  %v421_v47 = vadd.f32 %v420_v26, %v418_v60  ;;  %v436_v48 = vmul.f32 %v435_v44, %v1494_v8  ;;  %v452_v49 = vmul.f32 %v451_v45, %v1494_v8  ;;  %s1133_s15 = smov [#allocation9]  }
  0x87   : > { %v467_v50 = vstv %s1489_s19  ;;  %v483_v51 = vstv %s1491_s4  ;;  %v499_v52 = vstv %s1500_s5  ;;  %v515_v53 = vstv %s1502_s21  ;;  %s1573_s19 = sld [smem:[#allocation6 + $0x35]]  ;;  %s1585_s4 = sld [smem:[#allocation7]] }
  0x88   : > { %v437_v54 = vadd.f32 %v436_v48, %v434_v4  ;;  %v453_v55 = vadd.f32 %v452_v49, %v450_v5  ;;  %v468_v56 = vmul.f32 %v467_v50, %v1494_v8  ;;  %v484_v57 = vmul.f32 %v483_v51, %v1494_v8  ;;  %s1587_s5 = sld [smem:[#allocation7 + $0x1]]  ;;  %s1591_s21 = sld [smem:[#allocation7 + $0x2]] }
  0x89   : > { %v500_v59 = vmul.f32 %v499_v52, %v1494_v8  ;;  %v516_v60 = vmul.f32 %v515_v53, %v1494_v8  ;;  %v530_v61 = vadd.f32 %v529_v15, %v1405_v27  ;;  %v531_v62 = vstv %s1508_s10  ;;  %s1593_s10 = sld [smem:[#allocation7 + $0x3]] }
  0x8a   : > { %v469_v63 = vadd.f32 %v468_v56, %v466_v13  ;;  %v485_v1 = vadd.f32 %v484_v57, %v482_v14  ;;  %v532_v2 = vmul.f32 %v531_v62, %v1494_v8  ;;  %v1567_v3 = vadd.f32 %v545_v16, %v1417_v31 }
  0x8b   : > { %v345_v4 = vstv %s1524_s0  ;;  %v358_v27 = vstv %s1526_s11  ;;  %v501_v5 = vadd.f32 %v500_v59, %v498_v20  ;;  %v517_v6 = vadd.f32 %v516_v60, %v514_v21  ;;  %s1597_s0 = sld [smem:[#allocation7 + $0x4]]  ;;  %s1599_s11 = sld [smem:[#allocation7 + $0x5]] }
  0x8c   : > { %v346_v7 = vmul.f32 %v345_v4, %v1555_v58  ;;  %v359_v9 = vmul.f32 %v358_v27, %v1555_v58  ;;  %v374_v10 = vstv %s1530_s1  ;;  %v390_v11 = vstv %s1532_s22  ;;  %s1605_s1 = sld [smem:[#allocation7 + $0x6]]  ;;  %s1607_s22 = sld [smem:[#allocation7 + $0x7]] }
  0x8d   : > { %v375_v12 = vmul.f32 %v374_v10, %v1555_v58  ;;  %v391_v31 = vmul.f32 %v390_v11, %v1555_v58  ;;  %v406_v13 = vstv %s1536_s27  ;;  %v422_v14 = vstv %s1538_s29  ;;  %s1611_s27 = sld [smem:[#allocation7 + $0x8]]  ;;  %s1613_s29 = sld [smem:[#allocation7 + $0x9]] }
  0x8e   : > { %v347_v15 = vadd.f32 %v346_v7, %v344_v38  ;;  %v360_v16 = vadd.f32 %v359_v9, %v357_v39  ;;  %v407_v17 = vmul.f32 %v406_v13, %v1555_v58  ;;  %v423_v18 = vmul.f32 %v422_v14, %v1555_v58 }
  0x8f   : > { %v376_v20 = vadd.f32 %v375_v12, %v373_v40  ;;  %v392_v21 = vadd.f32 %v391_v31, %v389_v43  ;;  %v438_v24 = vstv %s1544_s6  ;;  %v454_v19 = vstv %s1546_s30  ;;  %s1618_s6 = sld [smem:[#allocation7 + $0xa]]  ;;  %s1620_s30 = sld [smem:[#allocation7 + $0xb]] }
  0x90   : > { %v408_v25 = vadd.f32 %v407_v17, %v405_v46  ;;  %v424_v22 = vadd.f32 %v423_v18, %v421_v47  ;;  %v439_v28 = vmul.f32 %v438_v24, %v1555_v58  ;;  %v455_v29 = vmul.f32 %v454_v19, %v1555_v58 }
  0x91   : > { %v470_v33 = vstv %s1550_s7  ;;  %v486_v34 = vstv %s1552_s23  ;;  %v502_v38 = vstv %s1561_s9  ;;  %v518_v39 = vstv %s1563_s20  ;;  %s1626_s7 = sld [smem:[#allocation6 + $0x49]]  ;;  %s1628_s23 = sld [smem:[#allocation7 + $0xc]] }
  0x92   : > { %v440_v23 = vadd.f32 %v439_v28, %v437_v54  ;;  %v456_v26 = vadd.f32 %v455_v29, %v453_v55  ;;  %v471_v40 = vmul.f32 %v470_v33, %v1555_v58  ;;  %v487_v43 = vmul.f32 %v486_v34, %v1555_v58  ;;  %s1634_s9 = sld [smem:[#allocation6 + $0x22]]  ;;  %s1636_s20 = sld [smem:[#allocation7 + $0xd]] }
  0x93   : > { %v503_v44 = vmul.f32 %v502_v38, %v1555_v58  ;;  %v519_v45 = vmul.f32 %v518_v39, %v1555_v58  ;;  %v533_v46 = vadd.f32 %v532_v2, %v530_v61  ;;  %v534_v47 = vstv %s1569_s28  ;;  %s1639_s28 = sld [smem:[#allocation6 + $0x36]] }
  0x94   : > { %v472_v48 = vadd.f32 %v471_v40, %v469_v63  ;;  %v488_v49 = vadd.f32 %v487_v43, %v485_v1  ;;  %v535_v50 = vmul.f32 %v534_v47, %v1555_v58  ;;  %v547_v51 = vstv %s1573_s19  ;;  %s1642_s19 = sld [smem:[#allocation6 + $0x4a]] }
  0x95   : > { %v348_v52 = vstv %s1585_s4  ;;  %v361_v53 = vstv %s1587_s5  ;;  %v504_v54 = vadd.f32 %v503_v44, %v501_v5  ;;  %v520_v55 = vadd.f32 %v519_v45, %v517_v6  ;;  %s1648_s4 = sld [smem:[#allocation6 + $0x23]]  ;;  %s1650_s5 = sld [smem:[#allocation7 + $0xe]] }
  0x96   : > { %v349_v56 = vadd.f32 %v348_v52, %v347_v15  ;;  %v362_v57 = vadd.f32 %v361_v53, %v360_v16  ;;  %v377_v59 = vstv %s1591_s21  ;;  %v393_v60 = vstv %s1593_s10  ;;  %s1654_s21 = sld [smem:[#allocation6 + $0x37]]  ;;  %s1660_s10 = sld [smem:[#allocation6 + $0x4b]] }
  0x97   : > { %v378_v61 = vadd.f32 %v377_v59, %v376_v20  ;;  %v394_v62 = vadd.f32 %v393_v60, %v392_v21  ;;  %v409_v63 = vstv %s1597_s0  ;;  %v425_v1 = vstv %s1599_s11  ;;  %s1662_s0 = sld [smem:[#allocation7 + $0xf]]  ;;  %s1670_s11 = sld [smem:[#allocation6 + $0x24]] }
  0x98   : > { %vm363_vm0 = vcmp.gt.f32.partialorder %v362_v57, %v349_v56  ;;  %v410_v2 = vadd.f32 %v409_v63, %v408_v25  ;;  %v426_v4 = vadd.f32 %v425_v1, %v424_v22  ;;  %v441_v27 = vstv %s1605_s1  ;;  %s1677_s1 = sld [smem:[#allocation6 + $0x38]] }
  0x99   : > { %v364_v5 = vsel %vm363_vm0, %v362_v57, %v349_v56  ;;  %v1132_v6 = vmov 0   ;;  %v442_v9 = vadd.f32 %v441_v27, %v440_v23  ;;  %v457_v10 = vstv %s1607_s22  ;;  %s1679_s22 = sld [smem:[#allocation6 + $0x4c]] }
  0x9a   : > { %v365_v7 = vsel %vm363_vm0, 1, %v1132_v6  ;;  %vm379_vm1 = vcmp.gt.f32.partialorder %v378_v61, %v364_v5  ;;  %v458_v11 = vadd.f32 %v457_v10, %v456_v26  ;;  %v473_v12 = vstv %s1611_s27  ;;  %s1685_s27 = sld [smem:[#allocation7 + $0x10]] }
  0x9b   : > { %v489_v31 = vstv %s1613_s29  ;;  %v380_v13 = vsel %vm379_vm1, %v378_v61, %v364_v5  ;;  %v381_v14 = vsel %vm379_vm1, 2, %v365_v7  ;;  %v474_v15 = vadd.f32 %v473_v12, %v472_v48  ;;  %s1691_s29 = sld [smem:[#allocation6 + $0x25]] }
  0x9c   : > { %v1646_v16 = vadd.f32 %v489_v31, %v488_v49  ;;  %vm395_vm2 = vcmp.gt.f32.partialorder %v394_v62, %v380_v13  ;;  %v505_v17 = vstv %s1618_s6  ;;  %v521_v18 = vstv %s1620_s30  ;;  %s1694_s6 = sld [smem:[#allocation6 + $0x39]]  ;;  %s1700_s30 = sld [smem:[#allocation6 + $0x4d]] }
  0x9d   : > { %v536_v20 = vadd.f32 %v535_v50, %v533_v46  ;;  %v396_v21 = vsel %vm395_vm2, %v394_v62, %v380_v13  ;;  %v397_v24 = vsel %vm395_vm2, 3, %v381_v14  ;;  %v1656_v19 = vadd.f32 %v505_v17, %v504_v54 }
  0x9e   : > { %v1658_v25 = vadd.f32 %v521_v18, %v520_v55  ;;  %vm411_vm3 = vcmp.gt.f32.partialorder %v410_v2, %v396_v21  ;;  %v537_v22 = vstv %s1628_s23  ;;  %v548_v28 = vmul.f32 %v547_v51, %v1494_v8  ;;  %s1710_s23 = sld [smem:[#allocation6 + $0x26]] }
  0x9f   : > { %v550_v29 = vstv %s1626_s7  ;;  %v412_v33 = vsel %vm411_vm3, %v410_v2, %v396_v21  ;;  %v413_v34 = vsel %vm411_vm3, 4, %v397_v24  ;;  %v1667_v38 = vadd.f32 %v537_v22, %v536_v20  ;;  %s1702_s7 = sld [smem:[#allocation7 + $0x11]] }
  0xa0   : > { %v551_v39 = vmul.f32 %v550_v29, %v1555_v58  ;;  %vm427_vm4 = vcmp.gt.f32.partialorder %v426_v4, %v412_v33  ;;  %v549_v23 = vadd.f32 %v548_v28, %v1567_v3  ;;  %v553_v26 = vstv %s1636_s20  ;;  %s1720_s20 = sld [smem:[#allocation6 + $0x4e]] }
  0xa1   : > { %v560_v40 = vstv %s1634_s9  ;;  %v428_v43 = vsel %vm427_vm4, %v426_v4, %v412_v33  ;;  %v429_v44 = vsel %vm427_vm4, 5, %v413_v34  ;;  %v563_v46 = vstv %s1639_s28  ;;  %s1712_s9 = sld [smem:[#allocation6 + $0x3a]]  ;;  %s1727_s28 = sld [smem:[#allocation6 + $0x27]] }
  0xa2   : > { %v561_v45 = vmul.f32 %v560_v40, %v1414_v30  ;;  %vm443_vm5 = vcmp.gt.f32.partialorder %v442_v9, %v428_v43  ;;  %v552_v47 = vadd.f32 %v551_v39, %v549_v23  ;;  %v564_v48 = vmul.f32 %v563_v46, %v1494_v8 }
  0xa3   : > { %v566_v49 = vstv %s1642_s19  ;;  %v444_v50 = vsel %vm443_vm5, %v442_v9, %v428_v43  ;;  %v445_v3 = vsel %vm443_vm5, 6, %v429_v44  ;;  %v569_v54 = vstv %s1650_s5  ;;  %s1729_s19 = sld [smem:[#allocation6 + $0x3b]]  ;;  %s1738_s5 = sld [smem:[#allocation7 + $0x12]] }
  0xa4   : > { %v562_v51 = vadd.f32 %v561_v45, %v1420_v32  ;;  %v567_v52 = vmul.f32 %v566_v49, %v1555_v58  ;;  %vm459_vm6 = vcmp.gt.f32.partialorder %v458_v11, %v444_v50  ;;  %v1687_v53 = vadd.f32 %v553_v26, %v552_v47 }
  0xa5   : > { %v576_v55 = vstv %s1648_s4  ;;  %v460_v56 = vsel %vm459_vm6, %v458_v11, %v444_v50  ;;  %v461_v57 = vsel %vm459_vm6, 7, %v445_v3  ;;  %v579_v32 = vstv %s1654_s21  ;;  %s1736_s4 = sld [smem:[#allocation6 + $0x4f]]  ;;  %s1750_s21 = sld [smem:[#allocation7 + $0x13]] }
  0xa6   : > { %v565_v59 = vadd.f32 %v564_v48, %v562_v51  ;;  %v577_v60 = vmul.f32 %v576_v55, %v1414_v30  ;;  %vm475_vm7 = vcmp.gt.f32.partialorder %v474_v15, %v460_v56  ;;  %v582_v61 = vstv %s1660_s10  ;;  %s785_s10 = sshll.u32 %s1298_s26, 3 }
  0xa7   : > { %v585_v62 = vstv %s1662_s0  ;;  %v476_v63 = vsel %vm475_vm7, %v474_v15, %v460_v56  ;;  %v477_v1 = vsel %vm475_vm7, 8, %v461_v57  ;;  %v580_v27 = vmul.f32 %v579_v32, %v1494_v8  ;;  %s232_s0 = scalar_lea.vmem [#allocation9], %s785_s10 }
  0xa8   : > { %v568_v2 = vadd.f32 %v567_v52, %v565_v59  ;;  %v578_v4 = vadd.f32 %v577_v60, %v1429_v35  ;;  %vm491_vm8 = vcmp.gt.f32.partialorder %v1646_v16, %v476_v63  ;;  %v583_v5 = vmul.f32 %v582_v61, %v1555_v58 }
  0xa9   : > { %v592_v6 = vstv %s1670_s11  ;;  %v492_v7 = vsel %vm491_vm8, %v1646_v16, %v476_v63  ;;  %v493_v9 = vsel %vm491_vm8, 9, %v477_v1  ;;  %v595_v12 = vstv %s1677_s1  ;;  %s669_s11 = sshll.u32 %s232_s0, 4  ;;  %s1773_s11 = int_to_ptr.vmem [resolvable:$true] %s669_s11 }
  0xaa   : > { %v570_v10 = vadd.f32 %v569_v54, %v568_v2  ;;  %v593_v11 = vmul.f32 %v592_v6, %v1414_v30  ;;  %vm507_vm9 = vcmp.gt.f32.partialorder %v1656_v19, %v492_v7  ;;  %v581_v35 = vadd.f32 %v580_v27, %v578_v4 }
  0xab   : > { %v598_v31 = vstv %s1679_s22  ;;  %v508_v13 = vsel %vm507_vm9, %v1656_v19, %v492_v7  ;;  %v509_v14 = vsel %vm507_vm9, 10, %v493_v9  ;;  %v596_v16 = vmul.f32 %v595_v12, %v1494_v8 }
  0xac   : > { %v594_v15 = vadd.f32 %v593_v11, %v1432_v36  ;;  %vm523_vm10 = vcmp.gt.f32.partialorder %v1658_v25, %v508_v13  ;;  %v584_v17 = vadd.f32 %v583_v5, %v581_v35  ;;  %v599_v18 = vmul.f32 %v598_v31, %v1555_v58 }
  0xad   : > { %v601_v20 = vstv %s1685_s27  ;;  %v524_v21 = vsel %vm523_vm10, %v1658_v25, %v508_v13  ;;  %v525_v24 = vsel %vm523_vm10, 11, %v509_v14  ;;  %v608_v19 = vstv %s1691_s29  ;;  %s1771_s27 = scalar_lea.hbm %s1823_s3, %s885_s2  ;;  %s655_s29 = scalar_lea.sflag [#allocation4], %s1298_s26 }
  0xae   : > { %v597_v22 = vadd.f32 %v596_v16, %v594_v15  ;;  %vm539_vm11 = vcmp.gt.f32.partialorder %v1667_v38, %v524_v21  ;;  %v586_v36 = vadd.f32 %v585_v62, %v584_v17  ;;  %v609_v28 = vmul.f32 %v608_v19, %v1414_v30 }
  0xaf   : > { %v611_v29 = vstv %s1694_s6  ;;  %v540_v33 = vsel %vm539_vm11, %v1667_v38, %v524_v21  ;;  %v541_v34 = vsel %vm539_vm11, 12, %v525_v24  ;;  %v614_v26 = vstv %s1700_s30  ;;  %s1035_s6 = scalar_lea.vmem %s1773_s11, 128  ;;  %s1039_s30 = sshll.u32 %s1133_s15, 4  ;;  %s1040_s30 = int_to_ptr.vmem [resolvable:$false] %s1039_s30 }
  0xb0   : > { %v600_v25 = vadd.f32 %v599_v18, %v597_v22  ;;  %v612_v39 = vmul.f32 %v611_v29, %v1494_v8  ;;  %vm555_vm12 = vcmp.gt.f32.partialorder %v1687_v53, %v540_v33  ;;  %v610_v23 = vadd.f32 %v609_v28, %v1435_v37  ;;  %p1036_p5 = scmp.ne.s32.totalorder %s1773_s11, %s1035_s6  ;;  %p1042_p11 = scmp.lt.s32.totalorder %s1773_s11, %s1040_s30 }
  0xb1   : > { %v617_v40 = vstv %s1702_s7  ;;  %v556_v43 = vsel %vm555_vm12, %v1687_v53, %v540_v33  ;;  %v557_v38 = vsel %vm555_vm12, 13, %v541_v34  ;;  %v615_v45 = vmul.f32 %v614_v26, %v1555_v58  ;;  %s1041_s7 = scalar_lea.vmem %s1040_s30, 256 }
  0xb2   : > { %v602_v44 = vadd.f32 %v601_v20, %v600_v25  ;;  %vm571_vm13 = vcmp.gt.f32.partialorder %v570_v10, %v556_v43  ;;  %v613_v46 = vadd.f32 %v612_v39, %v610_v23  ;;  %v624_v47 = vstv %s1710_s23  ;;  %p1037_p1 = pnand %p1036_p5, %p1848_p0  ;;  %p1043_p7 = scmp.lt.s32.totalorder %s1041_s7, %s1035_s6 }
  0xb3   : > { %v627_v48 = vstv %s1712_s9  ;;  %v572_v49 = vsel %vm571_vm13, %v570_v10, %v556_v43  ;;  %v573_v50 = vsel %vm571_vm13, 14, %v557_v38  ;;  %v625_v37 = vmul.f32 %v624_v47, %v1414_v30 }
  0xb4   : > { %v628_v3 = vmul.f32 %v627_v48, %v1494_v8  ;;  %vm587_vm14 = vcmp.gt.f32.partialorder %v586_v36, %v572_v49  ;;  %v616_v51 = vadd.f32 %v615_v45, %v613_v46  ;;  %v630_v52 = vstv %s1720_s20  ;;  %p1038_p6 = pneg %p1037_p1  ;;  %p1044_p3 = por %p1043_p7, %p1042_p11 }
  0xb5   : > { %v639_v53 = vmul.f32 %v638_v42, %v1327_v0  ;;  %v588_v54 = vsel %vm587_vm14, %v586_v36, %v572_v49  ;;  %v589_v55 = vsel %vm587_vm14, 15, %v573_v50  ;;  %v626_v56 = vadd.f32 %v625_v37, %v1445_v41 }
  0xb6   : > { %v631_v57 = vmul.f32 %v630_v52, %v1555_v58  ;;  %vm603_vm15 = vcmp.gt.f32.partialorder %v602_v44, %v588_v54  ;;  %v618_v59 = vadd.f32 %v617_v40, %v616_v51  ;;  %v640_v60 = vstv %s1727_s28  ;;  %p1045_p8 = pnand %p1044_p3, %p1038_p6 }
  0xb7   : > { %v643_v32 = vstv %s1729_s19  ;;  %v604_v61 = vsel %vm603_vm15, %v602_v44, %v588_v54  ;;  %v629_v62 = vadd.f32 %v628_v3, %v626_v56  ;;  %v641_v63 = vmul.f32 %v640_v60, %v1414_v30 }
  0xb8   : > { %vm619_vm0 = vcmp.gt.f32.partialorder %v618_v59, %v604_v61  ;;  %v633_v0 = vstv %s1738_s5  ;;  %v644_v42 = vmul.f32 %v643_v32, %v1494_v8  ;;  %v646_v1 = vstv %s1736_s4 }
  0xb9   : > { %v605_v2 = vsel %vm603_vm15, 16, %v589_v55  ;;  %v632_v41 = vadd.f32 %v631_v57, %v629_v62  ;;  %v642_v4 = vadd.f32 %v641_v63, %v639_v53  ;;  %v620_v27 = vsel %vm619_vm0, %v618_v59, %v604_v61 }
  0xba   : > { %v647_v5 = vmul.f32 %v646_v1, %v1555_v58  ;;  %v621_v9 = vsel %vm619_vm0, 17, %v605_v2  ;;  %v649_v10 = vstv %s1750_s21 }
  0xbb   : > { %v634_v6 = vadd.f32 %v633_v0, %v632_v41  ;;  %v645_v7 = vadd.f32 %v644_v42, %v642_v4 }
  0xbd   : > { %vm635_vm1 = vcmp.gt.f32.partialorder %v634_v6, %v620_v27  ;;  %v648_v30 = vadd.f32 %v647_v5, %v645_v7 }
  0xbe   : > { %v636_v11 = vsel %vm635_vm1, %v634_v6, %v620_v27  ;;  %v637_v8 = vsel %vm635_vm1, 18, %v621_v9 }
  0xbf   : > { %v650_v35 = vadd.f32 %v649_v10, %v648_v30 }
  0xc1   : > { %vm651_vm2 = vcmp.gt.f32.partialorder %v650_v35, %v636_v11 }
  0xc2   : > { %v652_v58 = vsel %vm651_vm2, 19, %v637_v8 }
  0xc3   : > { %653 = vst [vmem:[%s232_s0] sm:$0xff] %v652_v58 }
  0xc4   : > { %1048 = shalt.err (!%p1045_p8)
}
  0xc5   : > { %s1049_s26 = scalar_lea.hbm %s1771_s27, 128  ;;  %s1053_s20 = scalar_lea.hbm %s1823_s3, 256 }
  0xc6   : > { %p1050_p13 = scmp.ne.s32.totalorder %s1771_s27, %s1049_s26  ;;  %p1054_p12 = scmp.lt.u32.totalorder %s1771_s27, %s1823_s3 }
  0xc7   : > { %p1055_p2 = scmp.lt.u32.totalorder %s1053_s20, %s1049_s26  ;;  %p1057_p5 = scmp.lt.u32.totalorder %s1049_s26, %s1771_s27 }
  0xc8   : > { %p1051_p4 = pnand %p1050_p13, %p1848_p0 }
  0xc9   : > { %p1056_p9 = por %p1055_p2, %p1054_p12 }
  0xca   : > { %p1052_p10 = pneg %p1051_p4 }
  0xcb   : > { %p1058_p1 = por %p1057_p5, %p1056_p9 }
  0xcd   : > { %p1059_p6 = pnand %p1058_p1, %p1052_p10 }
  0xcf   : > { %1062 = shalt.err (!%p1059_p6)
}
  0xd0   : > { %899 = dma.vmem_to_hbm [thread:$0]  (%p1848_p0), %s1773_s11, 128, %s1771_s27, %s655_s29  }
  0xd1 PF: > { %s681_s4 = sand.u32 1, %s1105_s12   ;;  %p1849_p11 = scmp.ne.s32.totalorder %s1837_s25, 0 }
  0xd2   : > { %p1850_p7 = scmp.ge.s32.totalorder %s1125_s17, 2  ;;  %s682_s5 = scalar_lea.sflag [#allocation4], %s681_s4 }
  0xd4   : > { %p913_p3 = pnand %p1850_p7, %p1849_p11 }
  0xd6   : > { %1100 = dma.done.wait (!%p913_p3), %s682_s5, 128  }
  0xd7   : > { %1102 = vsyncadd (!%p913_p3), %s682_s5, 4294967168  ;;  %s21_s17 = sadd.s32 1, %s1125_s17   ;;  %s1851_s12 = smov %s1109_s13 }
  0xd8   : > { %p18_p8 = scmp.ge.s32.totalorder %s21_s17, 4   ;;  %s1852_s13 = smov %s1113_s14 }
  0xd9   : > { %s1853_s14 = smov %s1265_s8  ;;  %s1854_s15 = smov %s1121_s16 }
  0xda   : > { %s1855_s16 = smov %s1857_s18  ;;  %20 = sbr.rel (!%p18_p8) target bundleno = 12 (0xc), region = 86 }
  0xe1   :  { %687 = vsyncpa [#allocation3], 1 }
  0xe2   :  { %689 = vsyncpa [#allocation3 + $0x1], 1 }
  0xe3   :  { %690 = vsyncpa [#allocation4], 1 }
  0xe4   :  { %692 = vsyncpa [#allocation4 + $0x1], 1 }
  0xe5   :  { %693 = vsyncpa [#allocation5], 1 }
  0xe6   :  { %695 = vsyncpa [#allocation5 + $0x1], 1 }
  0xe7   :  { %696 = vsyncpa [#allocation8], 1 }

</bundles_post_ra>
